<compile_context>
chip_gen: v5e
topology: v5e:2x2
jax: 0.10.0
libtpu: 0.0.40
codegen_flags: <defaults>
</compile_context>

<pallas_src>
import functools

import jax
import jax.numpy as jnp
from jax.experimental import pallas as pl
from jax.experimental.pallas import tpu as pltpu


def _rnn_kernel(tokens_ref, wih_ref, whh_ref, bh_ref, wfc_ref, bfc_ref, h0_ref,
                logits_ref, hn_ref):
    """Single gridless invocation: token gather + recurrence + fused head.

    tokens_ref : (T, B) int32, SMEM (time-major token ids)
    wih_ref    : (V, H)  = W_ih^T          (VMEM)
    whh_ref    : (H, H)  = W_hh^T          (VMEM)
    bh_ref     : (1, H)  = b_ih + b_hh     (VMEM)
    wfc_ref    : (H, V)  = W_fc^T          (VMEM, f32 or bf16)
    bfc_ref    : (1, V)                    (VMEM)
    h0_ref     : (B, H)                    (VMEM)
    logits_ref : (T, B, V)  time-major logits
    hn_ref     : (B, H)     final hidden state
    """
    T, B = tokens_ref.shape
    V, H = wih_ref.shape

    # Hoist loop-invariant loads once (not per step).
    w_hh = whh_ref[...]
    w_fc = wfc_ref[...]
    bh = bh_ref[...]      # (1, H)
    bfc = bfc_ref[...]    # (1, V)

    def gather_xproj(t):
        # One-hot x_t @ W_ih^T == row gather from W_ih^T.  Token ids are cheap
        # SMEM scalar reads; each row is a dynamic sublane slice of VMEM.
        rows = [wih_ref[pl.ds(tokens_ref[t, b], 1), :] for b in range(B)]
        return jnp.concatenate(rows, axis=0) + bh              # (B, H)

    def step(t, h):
        # Serial critical path: h @ W_hh^T + tanh.  The gather above and the
        # head matmul below do not sit on the h_{t-1} -> h_t dependency and
        # hide under its tanh / MXU-latency slack.
        h_new = jnp.tanh(
            gather_xproj(t)
            + jnp.dot(h, w_hh, preferred_element_type=jnp.float32))
        # Fused Linear head for this step (no (T,B,H) buffer, no epilogue GEMM).
        logits_t = (jnp.dot(h_new.astype(w_fc.dtype), w_fc,
                            preferred_element_type=jnp.float32) + bfc)
        logits_ref[pl.ds(t, 1), :, :] = logits_t[None].astype(logits_ref.dtype)
        return h_new

    # Full unroll only while T is small; partial unroll once T grows.
    unroll = True if T <= 8 else 8
    h_last = jax.lax.fori_loop(0, T, step, h0_ref[...].astype(jnp.float32),
                               unroll=unroll)
    hn_ref[...] = h_last.astype(hn_ref.dtype)


def one_hot_rnn_forward_tokens(tokens, h0, params):
    """Fast path: tokens (B, T) int32, h0 (1, B, H) or None.

    Returns (logits (B, T, V) f32, hn (1, B, H) f32)."""
    B, T = tokens.shape
    V, H = params["w_ih"].shape
    if h0 is None:
        h0 = jnp.zeros((1, B, H), jnp.float32)

    tokens_tb = jnp.transpose(tokens).astype(jnp.int32)          # (T, B)
    bh = (params["b_ih"] + params["b_hh"]).reshape(1, H).astype(jnp.float32)
    bfc = params["b_fc"].reshape(1, V).astype(jnp.float32)

    vmem = lambda: pl.BlockSpec(memory_space=pltpu.MemorySpace.VMEM)
    smem = pl.BlockSpec(memory_space=pltpu.MemorySpace.SMEM)

    logits_tbv, hn_bh = pl.pallas_call(
        _rnn_kernel,
        out_shape=(
            jax.ShapeDtypeStruct((T, B, V), jnp.float32),   # logits, time-major
            jax.ShapeDtypeStruct((B, H), jnp.float32),      # hn
        ),
        in_specs=[smem, vmem(), vmem(), vmem(), vmem(), vmem(), vmem()],
        out_specs=(vmem(), vmem()),
    )(tokens_tb, params["w_ih"], params["w_hh"], bh, params["w_fc"], bfc,
      h0[0].astype(jnp.float32))

    logits = jnp.transpose(logits_tbv, (1, 0, 2))                # (B, T, V)
    hn = hn_bh[None, :, :]                                       # (1, B, H)
    return logits, hn


def one_hot_rnn_forward(x, h0, params):
    """Matches OneHotRNN.forward(x, h0): x is a one-hot (B, T, V) float tensor.

    The module's inputs are one-hot by construction, so recovering token ids
    is exact and the first GEMM collapses to a row gather inside the kernel.
    """
    # TODO(synk): a general dense-x path would keep a (T*B,V)@(V,H) input GEMM.
    tokens = jnp.argmax(x, axis=-1).astype(jnp.int32)
    return one_hot_rnn_forward_tokens(tokens, h0, params)


def reference_forward(x, h0, params):
    """Pure-JAX reference matching torch.nn.RNN(batch_first=True) + Linear."""
    hi = jax.lax.Precision.HIGHEST
    bh = params["b_ih"] + params["b_hh"]

    def step(h, x_t):
        h_new = jnp.tanh(jnp.dot(x_t, params["w_ih"], precision=hi)
                         + jnp.dot(h, params["w_hh"], precision=hi) + bh)
        return h_new, h_new

    x_tbv = jnp.transpose(x, (1, 0, 2))
    hn, out_tbh = jax.lax.scan(step, h0[0], x_tbv)
    out = jnp.transpose(out_tbh, (1, 0, 2))
    logits = jnp.dot(out, params["w_fc"], precision=hi) + params["b_fc"]
    return logits, hn[None]


def init_params(key, vocab_size, hidden_size):
    """Deterministic init, PyTorch-style uniform(-1/sqrt(H), 1/sqrt(H)).
    Weights stored pre-transposed for the kernel (x @ W layouts).
    Pass w_fc (and optionally w_ih) in bf16 to use the bf16 MXU path on
    v6e/v7x; kept f32 here to match the f32 reference tightly."""
    ks = jax.random.split(key, 6)
    bound = 1.0 / jnp.sqrt(hidden_size)
    u = lambda k, s: jax.random.uniform(k, s, jnp.float32, -bound, bound)
    return {
        "w_ih": u(ks[0], (vocab_size, hidden_size)),   # = W_ih^T
        "w_hh": u(ks[1], (hidden_size, hidden_size)),  # = W_hh^T
        "b_ih": u(ks[2], (hidden_size,)),
        "b_hh": u(ks[3], (hidden_size,)),
        "w_fc": u(ks[4], (hidden_size, vocab_size)),   # = W_fc^T
        "b_fc": u(ks[5], (vocab_size,)),
    }


if __name__ == "__main__":
    # B = 8 (f32 sublane count), small seq/vocab/hidden consistent with module.
    B, T, V, H = 8, 8, 16, 32

    key = jax.random.PRNGKey(0)
    k_tok, k_h0, k_par = jax.random.split(key, 3)

    # One-hot encoded token sequence (the "OneHot" in OneHotRNN) — only used
    # for the module-level interface and the reference; the kernel path works
    # on token ids directly.
    tokens = jax.random.randint(k_tok, (B, T), 0, V)
    x = jax.nn.one_hot(tokens, V, dtype=jnp.float32)             # (B, T, V)
    h0 = jax.random.normal(k_h0, (1, B, H), dtype=jnp.float32)   # (1, B, H)

    params = init_params(k_par, V, H)

    fwd = jax.jit(functools.partial(one_hot_rnn_forward, params=params))
    logits, hn = fwd(x, h0)
    jax.block_until_ready((logits, hn))

    ref_logits, ref_hn = reference_forward(x, h0, params)
    assert logits.shape == (B, T, V) and hn.shape == (1, B, H)
    assert jnp.allclose(logits, ref_logits, atol=1e-4, rtol=1e-4)
    assert jnp.allclose(hn, ref_hn, atol=1e-4, rtol=1e-4)

    print("KERNEL_OK")
</pallas_src>

<mosaic_0001>
module attributes {stable_mosaic.version = 11 : i64} {
  func.func @_rnn_kernel(%arg0: memref<8x8xi32, #tpu.memory_space<smem>>, %arg1: memref<16x32xf32, #tpu.memory_space<vmem>>, %arg2: memref<32x32xf32, #tpu.memory_space<vmem>>, %arg3: memref<1x32xf32, #tpu.memory_space<vmem>>, %arg4: memref<32x16xf32, #tpu.memory_space<vmem>>, %arg5: memref<1x16xf32, #tpu.memory_space<vmem>>, %arg6: memref<8x32xf32, #tpu.memory_space<vmem>>, %arg7: memref<8x8x16xf32, #tpu.memory_space<vmem>>, %arg8: memref<8x32xf32, #tpu.memory_space<vmem>>) attributes {dimension_semantics = [], scalar_prefetch = 0 : i64, scratch_operands = 0 : i64, tpu.core_type = #tpu.core_type<tc>} {
    %c0 = arith.constant 0 : index
    %c0_0 = arith.constant 0 : index
    %0 = vector.load %arg2[%c0, %c0_0] : memref<32x32xf32, #tpu.memory_space<vmem>>, vector<32x32xf32>
    %c0_1 = arith.constant 0 : index
    %c0_2 = arith.constant 0 : index
    %1 = vector.load %arg4[%c0_1, %c0_2] : memref<32x16xf32, #tpu.memory_space<vmem>>, vector<32x16xf32>
    %c0_3 = arith.constant 0 : index
    %c0_4 = arith.constant 0 : index
    %2 = vector.load %arg3[%c0_3, %c0_4] : memref<1x32xf32, #tpu.memory_space<vmem>>, vector<1x32xf32>
    %c0_5 = arith.constant 0 : index
    %c0_6 = arith.constant 0 : index
    %3 = vector.load %arg5[%c0_5, %c0_6] : memref<1x16xf32, #tpu.memory_space<vmem>>, vector<1x16xf32>
    %c0_7 = arith.constant 0 : index
    %c0_8 = arith.constant 0 : index
    %4 = vector.load %arg6[%c0_7, %c0_8] : memref<8x32xf32, #tpu.memory_space<vmem>>, vector<8x32xf32>
    %c0_i32 = arith.constant 0 : i32
    %5 = arith.index_cast %c0_i32 : i32 to index
    %c0_9 = arith.constant 0 : index
    %6 = memref.load %arg0[%5, %c0_9] : memref<8x8xi32, #tpu.memory_space<smem>>
    %7 = arith.index_cast %6 : i32 to index
    %c0_10 = arith.constant 0 : index
    %8 = vector.load %arg1[%7, %c0_10] : memref<16x32xf32, #tpu.memory_space<vmem>>, vector<1x32xf32>
    %9 = arith.index_cast %c0_i32 : i32 to index
    %c1 = arith.constant 1 : index
    %10 = memref.load %arg0[%9, %c1] : memref<8x8xi32, #tpu.memory_space<smem>>
    %11 = arith.index_cast %10 : i32 to index
    %c0_11 = arith.constant 0 : index
    %12 = vector.load %arg1[%11, %c0_11] : memref<16x32xf32, #tpu.memory_space<vmem>>, vector<1x32xf32>
    %13 = arith.index_cast %c0_i32 : i32 to index
    %c2 = arith.constant 2 : index
    %14 = memref.load %arg0[%13, %c2] : memref<8x8xi32, #tpu.memory_space<smem>>
    %15 = arith.index_cast %14 : i32 to index
    %c0_12 = arith.constant 0 : index
    %16 = vector.load %arg1[%15, %c0_12] : memref<16x32xf32, #tpu.memory_space<vmem>>, vector<1x32xf32>
    %17 = arith.index_cast %c0_i32 : i32 to index
    %c3 = arith.constant 3 : index
    %18 = memref.load %arg0[%17, %c3] : memref<8x8xi32, #tpu.memory_space<smem>>
    %19 = arith.index_cast %18 : i32 to index
    %c0_13 = arith.constant 0 : index
    %20 = vector.load %arg1[%19, %c0_13] : memref<16x32xf32, #tpu.memory_space<vmem>>, vector<1x32xf32>
    %21 = arith.index_cast %c0_i32 : i32 to index
    %c4 = arith.constant 4 : index
    %22 = memref.load %arg0[%21, %c4] : memref<8x8xi32, #tpu.memory_space<smem>>
    %23 = arith.index_cast %22 : i32 to index
    %c0_14 = arith.constant 0 : index
    %24 = vector.load %arg1[%23, %c0_14] : memref<16x32xf32, #tpu.memory_space<vmem>>, vector<1x32xf32>
    %25 = arith.index_cast %c0_i32 : i32 to index
    %c5 = arith.constant 5 : index
    %26 = memref.load %arg0[%25, %c5] : memref<8x8xi32, #tpu.memory_space<smem>>
    %27 = arith.index_cast %26 : i32 to index
    %c0_15 = arith.constant 0 : index
    %28 = vector.load %arg1[%27, %c0_15] : memref<16x32xf32, #tpu.memory_space<vmem>>, vector<1x32xf32>
    %29 = arith.index_cast %c0_i32 : i32 to index
    %c6 = arith.constant 6 : index
    %30 = memref.load %arg0[%29, %c6] : memref<8x8xi32, #tpu.memory_space<smem>>
    %31 = arith.index_cast %30 : i32 to index
    %c0_16 = arith.constant 0 : index
    %32 = vector.load %arg1[%31, %c0_16] : memref<16x32xf32, #tpu.memory_space<vmem>>, vector<1x32xf32>
    %33 = arith.index_cast %c0_i32 : i32 to index
    %c7 = arith.constant 7 : index
    %34 = memref.load %arg0[%33, %c7] : memref<8x8xi32, #tpu.memory_space<smem>>
    %35 = arith.index_cast %34 : i32 to index
    %c0_17 = arith.constant 0 : index
    %36 = vector.load %arg1[%35, %c0_17] : memref<16x32xf32, #tpu.memory_space<vmem>>, vector<1x32xf32>
    %37 = tpu.concatenate %8, %12, %16, %20, %24, %28, %32, %36 in 0 : vector<1x32xf32>, vector<1x32xf32>, vector<1x32xf32>, vector<1x32xf32>, vector<1x32xf32>, vector<1x32xf32>, vector<1x32xf32>, vector<1x32xf32> -> vector<8x32xf32>
    %38 = vector.broadcast %2 : vector<1x32xf32> to vector<8x32xf32>
    %39 = arith.addf %37, %38 : vector<8x32xf32>
    %cst = arith.constant dense<0.000000e+00> : vector<8x32xf32>
    %40 = tpu.matmul %4, %0, %cst {dimension_numbers = #tpu.dot_dimension_numbers<[1], [0], [0], [1], [0, 0, 1, 1], [], []>} : vector<8x32xf32>, vector<32x32xf32>, vector<8x32xf32> -> vector<8x32xf32>
    %41 = arith.addf %39, %40 : vector<8x32xf32>
    %42 = math.tanh %41 : vector<8x32xf32>
    %cst_18 = arith.constant dense<0.000000e+00> : vector<8x16xf32>
    %43 = tpu.matmul %42, %1, %cst_18 {dimension_numbers = #tpu.dot_dimension_numbers<[1], [0], [0], [1], [0, 0, 1, 1], [], []>} : vector<8x32xf32>, vector<32x16xf32>, vector<8x16xf32> -> vector<8x16xf32>
    %44 = vector.broadcast %3 : vector<1x16xf32> to vector<8x16xf32>
    %45 = arith.addf %43, %44 : vector<8x16xf32>
    %46 = vector.shape_cast %45 : vector<8x16xf32> to vector<1x8x16xf32>
    %47 = arith.index_cast %c0_i32 : i32 to index
    %c0_19 = arith.constant 0 : index
    %c0_20 = arith.constant 0 : index
    %48 = vector.load %arg7[%47, %c0_19, %c0_20] : memref<8x8x16xf32, #tpu.memory_space<vmem>>, vector<1x8x16xf32>
    tpu.vector_store %arg7[%47, %c0_19, %c0_20], %46 {strides = array<i32>} : memref<8x8x16xf32, #tpu.memory_space<vmem>>, vector<1x8x16xf32>,
    %c1_i32 = arith.constant 1 : i32
    %49 = arith.index_cast %c1_i32 : i32 to index
    %c0_21 = arith.constant 0 : index
    %50 = memref.load %arg0[%49, %c0_21] : memref<8x8xi32, #tpu.memory_space<smem>>
    %51 = arith.index_cast %50 : i32 to index
    %c0_22 = arith.constant 0 : index
    %52 = vector.load %arg1[%51, %c0_22] : memref<16x32xf32, #tpu.memory_space<vmem>>, vector<1x32xf32>
    %53 = arith.index_cast %c1_i32 : i32 to index
    %c1_23 = arith.constant 1 : index
    %54 = memref.load %arg0[%53, %c1_23] : memref<8x8xi32, #tpu.memory_space<smem>>
    %55 = arith.index_cast %54 : i32 to index
    %c0_24 = arith.constant 0 : index
    %56 = vector.load %arg1[%55, %c0_24] : memref<16x32xf32, #tpu.memory_space<vmem>>, vector<1x32xf32>
    %57 = arith.index_cast %c1_i32 : i32 to index
    %c2_25 = arith.constant 2 : index
    %58 = memref.load %arg0[%57, %c2_25] : memref<8x8xi32, #tpu.memory_space<smem>>
    %59 = arith.index_cast %58 : i32 to index
    %c0_26 = arith.constant 0 : index
    %60 = vector.load %arg1[%59, %c0_26] : memref<16x32xf32, #tpu.memory_space<vmem>>, vector<1x32xf32>
    %61 = arith.index_cast %c1_i32 : i32 to index
    %c3_27 = arith.constant 3 : index
    %62 = memref.load %arg0[%61, %c3_27] : memref<8x8xi32, #tpu.memory_space<smem>>
    %63 = arith.index_cast %62 : i32 to index
    %c0_28 = arith.constant 0 : index
    %64 = vector.load %arg1[%63, %c0_28] : memref<16x32xf32, #tpu.memory_space<vmem>>, vector<1x32xf32>
    %65 = arith.index_cast %c1_i32 : i32 to index
    %c4_29 = arith.constant 4 : index
    %66 = memref.load %arg0[%65, %c4_29] : memref<8x8xi32, #tpu.memory_space<smem>>
    %67 = arith.index_cast %66 : i32 to index
    %c0_30 = arith.constant 0 : index
    %68 = vector.load %arg1[%67, %c0_30] : memref<16x32xf32, #tpu.memory_space<vmem>>, vector<1x32xf32>
    %69 = arith.index_cast %c1_i32 : i32 to index
    %c5_31 = arith.constant 5 : index
    %70 = memref.load %arg0[%69, %c5_31] : memref<8x8xi32, #tpu.memory_space<smem>>
    %71 = arith.index_cast %70 : i32 to index
    %c0_32 = arith.constant 0 : index
    %72 = vector.load %arg1[%71, %c0_32] : memref<16x32xf32, #tpu.memory_space<vmem>>, vector<1x32xf32>
    %73 = arith.index_cast %c1_i32 : i32 to index
    %c6_33 = arith.constant 6 : index
    %74 = memref.load %arg0[%73, %c6_33] : memref<8x8xi32, #tpu.memory_space<smem>>
    %75 = arith.index_cast %74 : i32 to index
    %c0_34 = arith.constant 0 : index
    %76 = vector.load %arg1[%75, %c0_34] : memref<16x32xf32, #tpu.memory_space<vmem>>, vector<1x32xf32>
    %77 = arith.index_cast %c1_i32 : i32 to index
    %c7_35 = arith.constant 7 : index
    %78 = memref.load %arg0[%77, %c7_35] : memref<8x8xi32, #tpu.memory_space<smem>>
    %79 = arith.index_cast %78 : i32 to index
    %c0_36 = arith.constant 0 : index
    %80 = vector.load %arg1[%79, %c0_36] : memref<16x32xf32, #tpu.memory_space<vmem>>, vector<1x32xf32>
    %81 = tpu.concatenate %52, %56, %60, %64, %68, %72, %76, %80 in 0 : vector<1x32xf32>, vector<1x32xf32>, vector<1x32xf32>, vector<1x32xf32>, vector<1x32xf32>, vector<1x32xf32>, vector<1x32xf32>, vector<1x32xf32> -> vector<8x32xf32>
    %82 = vector.broadcast %2 : vector<1x32xf32> to vector<8x32xf32>
    %83 = arith.addf %81, %82 : vector<8x32xf32>
    %cst_37 = arith.constant dense<0.000000e+00> : vector<8x32xf32>
    %84 = tpu.matmul %42, %0, %cst_37 {dimension_numbers = #tpu.dot_dimension_numbers<[1], [0], [0], [1], [0, 0, 1, 1], [], []>} : vector<8x32xf32>, vector<32x32xf32>, vector<8x32xf32> -> vector<8x32xf32>
    %85 = arith.addf %83, %84 : vector<8x32xf32>
    %86 = math.tanh %85 : vector<8x32xf32>
    %cst_38 = arith.constant dense<0.000000e+00> : vector<8x16xf32>
    %87 = tpu.matmul %86, %1, %cst_38 {dimension_numbers = #tpu.dot_dimension_numbers<[1], [0], [0], [1], [0, 0, 1, 1], [], []>} : vector<8x32xf32>, vector<32x16xf32>, vector<8x16xf32> -> vector<8x16xf32>
    %88 = vector.broadcast %3 : vector<1x16xf32> to vector<8x16xf32>
    %89 = arith.addf %87, %88 : vector<8x16xf32>
    %90 = vector.shape_cast %89 : vector<8x16xf32> to vector<1x8x16xf32>
    %91 = arith.index_cast %c1_i32 : i32 to index
    %c0_39 = arith.constant 0 : index
    %c0_40 = arith.constant 0 : index
    %92 = vector.load %arg7[%91, %c0_39, %c0_40] : memref<8x8x16xf32, #tpu.memory_space<vmem>>, vector<1x8x16xf32>
    tpu.vector_store %arg7[%91, %c0_39, %c0_40], %90 {strides = array<i32>} : memref<8x8x16xf32, #tpu.memory_space<vmem>>, vector<1x8x16xf32>,
    %c2_i32 = arith.constant 2 : i32
    %93 = arith.index_cast %c2_i32 : i32 to index
    %c0_41 = arith.constant 0 : index
    %94 = memref.load %arg0[%93, %c0_41] : memref<8x8xi32, #tpu.memory_space<smem>>
    %95 = arith.index_cast %94 : i32 to index
    %c0_42 = arith.constant 0 : index
    %96 = vector.load %arg1[%95, %c0_42] : memref<16x32xf32, #tpu.memory_space<vmem>>, vector<1x32xf32>
    %97 = arith.index_cast %c2_i32 : i32 to index
    %c1_43 = arith.constant 1 : index
    %98 = memref.load %arg0[%97, %c1_43] : memref<8x8xi32, #tpu.memory_space<smem>>
    %99 = arith.index_cast %98 : i32 to index
    %c0_44 = arith.constant 0 : index
    %100 = vector.load %arg1[%99, %c0_44] : memref<16x32xf32, #tpu.memory_space<vmem>>, vector<1x32xf32>
    %101 = arith.index_cast %c2_i32 : i32 to index
    %c2_45 = arith.constant 2 : index
    %102 = memref.load %arg0[%101, %c2_45] : memref<8x8xi32, #tpu.memory_space<smem>>
    %103 = arith.index_cast %102 : i32 to index
    %c0_46 = arith.constant 0 : index
    %104 = vector.load %arg1[%103, %c0_46] : memref<16x32xf32, #tpu.memory_space<vmem>>, vector<1x32xf32>
    %105 = arith.index_cast %c2_i32 : i32 to index
    %c3_47 = arith.constant 3 : index
    %106 = memref.load %arg0[%105, %c3_47] : memref<8x8xi32, #tpu.memory_space<smem>>
    %107 = arith.index_cast %106 : i32 to index
    %c0_48 = arith.constant 0 : index
    %108 = vector.load %arg1[%107, %c0_48] : memref<16x32xf32, #tpu.memory_space<vmem>>, vector<1x32xf32>
    %109 = arith.index_cast %c2_i32 : i32 to index
    %c4_49 = arith.constant 4 : index
    %110 = memref.load %arg0[%109, %c4_49] : memref<8x8xi32, #tpu.memory_space<smem>>
    %111 = arith.index_cast %110 : i32 to index
    %c0_50 = arith.constant 0 : index
    %112 = vector.load %arg1[%111, %c0_50] : memref<16x32xf32, #tpu.memory_space<vmem>>, vector<1x32xf32>
    %113 = arith.index_cast %c2_i32 : i32 to index
    %c5_51 = arith.constant 5 : index
    %114 = memref.load %arg0[%113, %c5_51] : memref<8x8xi32, #tpu.memory_space<smem>>
    %115 = arith.index_cast %114 : i32 to index
    %c0_52 = arith.constant 0 : index
    %116 = vector.load %arg1[%115, %c0_52] : memref<16x32xf32, #tpu.memory_space<vmem>>, vector<1x32xf32>
    %117 = arith.index_cast %c2_i32 : i32 to index
    %c6_53 = arith.constant 6 : index
    %118 = memref.load %arg0[%117, %c6_53] : memref<8x8xi32, #tpu.memory_space<smem>>
    %119 = arith.index_cast %118 : i32 to index
    %c0_54 = arith.constant 0 : index
    %120 = vector.load %arg1[%119, %c0_54] : memref<16x32xf32, #tpu.memory_space<vmem>>, vector<1x32xf32>
    %121 = arith.index_cast %c2_i32 : i32 to index
    %c7_55 = arith.constant 7 : index
    %122 = memref.load %arg0[%121, %c7_55] : memref<8x8xi32, #tpu.memory_space<smem>>
    %123 = arith.index_cast %122 : i32 to index
    %c0_56 = arith.constant 0 : index
    %124 = vector.load %arg1[%123, %c0_56] : memref<16x32xf32, #tpu.memory_space<vmem>>, vector<1x32xf32>
    %125 = tpu.concatenate %96, %100, %104, %108, %112, %116, %120, %124 in 0 : vector<1x32xf32>, vector<1x32xf32>, vector<1x32xf32>, vector<1x32xf32>, vector<1x32xf32>, vector<1x32xf32>, vector<1x32xf32>, vector<1x32xf32> -> vector<8x32xf32>
    %126 = vector.broadcast %2 : vector<1x32xf32> to vector<8x32xf32>
    %127 = arith.addf %125, %126 : vector<8x32xf32>
    %cst_57 = arith.constant dense<0.000000e+00> : vector<8x32xf32>
    %128 = tpu.matmul %86, %0, %cst_57 {dimension_numbers = #tpu.dot_dimension_numbers<[1], [0], [0], [1], [0, 0, 1, 1], [], []>} : vector<8x32xf32>, vector<32x32xf32>, vector<8x32xf32> -> vector<8x32xf32>
    %129 = arith.addf %127, %128 : vector<8x32xf32>
    %130 = math.tanh %129 : vector<8x32xf32>
    %cst_58 = arith.constant dense<0.000000e+00> : vector<8x16xf32>
    %131 = tpu.matmul %130, %1, %cst_58 {dimension_numbers = #tpu.dot_dimension_numbers<[1], [0], [0], [1], [0, 0, 1, 1], [], []>} : vector<8x32xf32>, vector<32x16xf32>, vector<8x16xf32> -> vector<8x16xf32>
    %132 = vector.broadcast %3 : vector<1x16xf32> to vector<8x16xf32>
    %133 = arith.addf %131, %132 : vector<8x16xf32>
    %134 = vector.shape_cast %133 : vector<8x16xf32> to vector<1x8x16xf32>
    %135 = arith.index_cast %c2_i32 : i32 to index
    %c0_59 = arith.constant 0 : index
    %c0_60 = arith.constant 0 : index
    %136 = vector.load %arg7[%135, %c0_59, %c0_60] : memref<8x8x16xf32, #tpu.memory_space<vmem>>, vector<1x8x16xf32>
    tpu.vector_store %arg7[%135, %c0_59, %c0_60], %134 {strides = array<i32>} : memref<8x8x16xf32, #tpu.memory_space<vmem>>, vector<1x8x16xf32>,
    %c3_i32 = arith.constant 3 : i32
    %137 = arith.index_cast %c3_i32 : i32 to index
    %c0_61 = arith.constant 0 : index
    %138 = memref.load %arg0[%137, %c0_61] : memref<8x8xi32, #tpu.memory_space<smem>>
    %139 = arith.index_cast %138 : i32 to index
    %c0_62 = arith.constant 0 : index
    %140 = vector.load %arg1[%139, %c0_62] : memref<16x32xf32, #tpu.memory_space<vmem>>, vector<1x32xf32>
    %141 = arith.index_cast %c3_i32 : i32 to index
    %c1_63 = arith.constant 1 : index
    %142 = memref.load %arg0[%141, %c1_63] : memref<8x8xi32, #tpu.memory_space<smem>>
    %143 = arith.index_cast %142 : i32 to index
    %c0_64 = arith.constant 0 : index
    %144 = vector.load %arg1[%143, %c0_64] : memref<16x32xf32, #tpu.memory_space<vmem>>, vector<1x32xf32>
    %145 = arith.index_cast %c3_i32 : i32 to index
    %c2_65 = arith.constant 2 : index
    %146 = memref.load %arg0[%145, %c2_65] : memref<8x8xi32, #tpu.memory_space<smem>>
    %147 = arith.index_cast %146 : i32 to index
    %c0_66 = arith.constant 0 : index
    %148 = vector.load %arg1[%147, %c0_66] : memref<16x32xf32, #tpu.memory_space<vmem>>, vector<1x32xf32>
    %149 = arith.index_cast %c3_i32 : i32 to index
    %c3_67 = arith.constant 3 : index
    %150 = memref.load %arg0[%149, %c3_67] : memref<8x8xi32, #tpu.memory_space<smem>>
    %151 = arith.index_cast %150 : i32 to index
    %c0_68 = arith.constant 0 : index
    %152 = vector.load %arg1[%151, %c0_68] : memref<16x32xf32, #tpu.memory_space<vmem>>, vector<1x32xf32>
    %153 = arith.index_cast %c3_i32 : i32 to index
    %c4_69 = arith.constant 4 : index
    %154 = memref.load %arg0[%153, %c4_69] : memref<8x8xi32, #tpu.memory_space<smem>>
    %155 = arith.index_cast %154 : i32 to index
    %c0_70 = arith.constant 0 : index
    %156 = vector.load %arg1[%155, %c0_70] : memref<16x32xf32, #tpu.memory_space<vmem>>, vector<1x32xf32>
    %157 = arith.index_cast %c3_i32 : i32 to index
    %c5_71 = arith.constant 5 : index
    %158 = memref.load %arg0[%157, %c5_71] : memref<8x8xi32, #tpu.memory_space<smem>>
    %159 = arith.index_cast %158 : i32 to index
    %c0_72 = arith.constant 0 : index
    %160 = vector.load %arg1[%159, %c0_72] : memref<16x32xf32, #tpu.memory_space<vmem>>, vector<1x32xf32>
    %161 = arith.index_cast %c3_i32 : i32 to index
    %c6_73 = arith.constant 6 : index
    %162 = memref.load %arg0[%161, %c6_73] : memref<8x8xi32, #tpu.memory_space<smem>>
    %163 = arith.index_cast %162 : i32 to index
    %c0_74 = arith.constant 0 : index
    %164 = vector.load %arg1[%163, %c0_74] : memref<16x32xf32, #tpu.memory_space<vmem>>, vector<1x32xf32>
    %165 = arith.index_cast %c3_i32 : i32 to index
    %c7_75 = arith.constant 7 : index
    %166 = memref.load %arg0[%165, %c7_75] : memref<8x8xi32, #tpu.memory_space<smem>>
    %167 = arith.index_cast %166 : i32 to index
    %c0_76 = arith.constant 0 : index
    %168 = vector.load %arg1[%167, %c0_76] : memref<16x32xf32, #tpu.memory_space<vmem>>, vector<1x32xf32>
    %169 = tpu.concatenate %140, %144, %148, %152, %156, %160, %164, %168 in 0 : vector<1x32xf32>, vector<1x32xf32>, vector<1x32xf32>, vector<1x32xf32>, vector<1x32xf32>, vector<1x32xf32>, vector<1x32xf32>, vector<1x32xf32> -> vector<8x32xf32>
    %170 = vector.broadcast %2 : vector<1x32xf32> to vector<8x32xf32>
    %171 = arith.addf %169, %170 : vector<8x32xf32>
    %cst_77 = arith.constant dense<0.000000e+00> : vector<8x32xf32>
    %172 = tpu.matmul %130, %0, %cst_77 {dimension_numbers = #tpu.dot_dimension_numbers<[1], [0], [0], [1], [0, 0, 1, 1], [], []>} : vector<8x32xf32>, vector<32x32xf32>, vector<8x32xf32> -> vector<8x32xf32>
    %173 = arith.addf %171, %172 : vector<8x32xf32>
    %174 = math.tanh %173 : vector<8x32xf32>
    %cst_78 = arith.constant dense<0.000000e+00> : vector<8x16xf32>
    %175 = tpu.matmul %174, %1, %cst_78 {dimension_numbers = #tpu.dot_dimension_numbers<[1], [0], [0], [1], [0, 0, 1, 1], [], []>} : vector<8x32xf32>, vector<32x16xf32>, vector<8x16xf32> -> vector<8x16xf32>
    %176 = vector.broadcast %3 : vector<1x16xf32> to vector<8x16xf32>
    %177 = arith.addf %175, %176 : vector<8x16xf32>
    %178 = vector.shape_cast %177 : vector<8x16xf32> to vector<1x8x16xf32>
    %179 = arith.index_cast %c3_i32 : i32 to index
    %c0_79 = arith.constant 0 : index
    %c0_80 = arith.constant 0 : index
    %180 = vector.load %arg7[%179, %c0_79, %c0_80] : memref<8x8x16xf32, #tpu.memory_space<vmem>>, vector<1x8x16xf32>
    tpu.vector_store %arg7[%179, %c0_79, %c0_80], %178 {strides = array<i32>} : memref<8x8x16xf32, #tpu.memory_space<vmem>>, vector<1x8x16xf32>,
    %c4_i32 = arith.constant 4 : i32
    %181 = arith.index_cast %c4_i32 : i32 to index
    %c0_81 = arith.constant 0 : index
    %182 = memref.load %arg0[%181, %c0_81] : memref<8x8xi32, #tpu.memory_space<smem>>
    %183 = arith.index_cast %182 : i32 to index
    %c0_82 = arith.constant 0 : index
    %184 = vector.load %arg1[%183, %c0_82] : memref<16x32xf32, #tpu.memory_space<vmem>>, vector<1x32xf32>
    %185 = arith.index_cast %c4_i32 : i32 to index
    %c1_83 = arith.constant 1 : index
    %186 = memref.load %arg0[%185, %c1_83] : memref<8x8xi32, #tpu.memory_space<smem>>
    %187 = arith.index_cast %186 : i32 to index
    %c0_84 = arith.constant 0 : index
    %188 = vector.load %arg1[%187, %c0_84] : memref<16x32xf32, #tpu.memory_space<vmem>>, vector<1x32xf32>
    %189 = arith.index_cast %c4_i32 : i32 to index
    %c2_85 = arith.constant 2 : index
    %190 = memref.load %arg0[%189, %c2_85] : memref<8x8xi32, #tpu.memory_space<smem>>
    %191 = arith.index_cast %190 : i32 to index
    %c0_86 = arith.constant 0 : index
    %192 = vector.load %arg1[%191, %c0_86] : memref<16x32xf32, #tpu.memory_space<vmem>>, vector<1x32xf32>
    %193 = arith.index_cast %c4_i32 : i32 to index
    %c3_87 = arith.constant 3 : index
    %194 = memref.load %arg0[%193, %c3_87] : memref<8x8xi32, #tpu.memory_space<smem>>
    %195 = arith.index_cast %194 : i32 to index
    %c0_88 = arith.constant 0 : index
    %196 = vector.load %arg1[%195, %c0_88] : memref<16x32xf32, #tpu.memory_space<vmem>>, vector<1x32xf32>
    %197 = arith.index_cast %c4_i32 : i32 to index
    %c4_89 = arith.constant 4 : index
    %198 = memref.load %arg0[%197, %c4_89] : memref<8x8xi32, #tpu.memory_space<smem>>
    %199 = arith.index_cast %198 : i32 to index
    %c0_90 = arith.constant 0 : index
    %200 = vector.load %arg1[%199, %c0_90] : memref<16x32xf32, #tpu.memory_space<vmem>>, vector<1x32xf32>
    %201 = arith.index_cast %c4_i32 : i32 to index
    %c5_91 = arith.constant 5 : index
    %202 = memref.load %arg0[%201, %c5_91] : memref<8x8xi32, #tpu.memory_space<smem>>
    %203 = arith.index_cast %202 : i32 to index
    %c0_92 = arith.constant 0 : index
    %204 = vector.load %arg1[%203, %c0_92] : memref<16x32xf32, #tpu.memory_space<vmem>>, vector<1x32xf32>
    %205 = arith.index_cast %c4_i32 : i32 to index
    %c6_93 = arith.constant 6 : index
    %206 = memref.load %arg0[%205, %c6_93] : memref<8x8xi32, #tpu.memory_space<smem>>
    %207 = arith.index_cast %206 : i32 to index
    %c0_94 = arith.constant 0 : index
    %208 = vector.load %arg1[%207, %c0_94] : memref<16x32xf32, #tpu.memory_space<vmem>>, vector<1x32xf32>
    %209 = arith.index_cast %c4_i32 : i32 to index
    %c7_95 = arith.constant 7 : index
    %210 = memref.load %arg0[%209, %c7_95] : memref<8x8xi32, #tpu.memory_space<smem>>
    %211 = arith.index_cast %210 : i32 to index
    %c0_96 = arith.constant 0 : index
    %212 = vector.load %arg1[%211, %c0_96] : memref<16x32xf32, #tpu.memory_space<vmem>>, vector<1x32xf32>
    %213 = tpu.concatenate %184, %188, %192, %196, %200, %204, %208, %212 in 0 : vector<1x32xf32>, vector<1x32xf32>, vector<1x32xf32>, vector<1x32xf32>, vector<1x32xf32>, vector<1x32xf32>, vector<1x32xf32>, vector<1x32xf32> -> vector<8x32xf32>
    %214 = vector.broadcast %2 : vector<1x32xf32> to vector<8x32xf32>
    %215 = arith.addf %213, %214 : vector<8x32xf32>
    %cst_97 = arith.constant dense<0.000000e+00> : vector<8x32xf32>
    %216 = tpu.matmul %174, %0, %cst_97 {dimension_numbers = #tpu.dot_dimension_numbers<[1], [0], [0], [1], [0, 0, 1, 1], [], []>} : vector<8x32xf32>, vector<32x32xf32>, vector<8x32xf32> -> vector<8x32xf32>
    %217 = arith.addf %215, %216 : vector<8x32xf32>
    %218 = math.tanh %217 : vector<8x32xf32>
    %cst_98 = arith.constant dense<0.000000e+00> : vector<8x16xf32>
    %219 = tpu.matmul %218, %1, %cst_98 {dimension_numbers = #tpu.dot_dimension_numbers<[1], [0], [0], [1], [0, 0, 1, 1], [], []>} : vector<8x32xf32>, vector<32x16xf32>, vector<8x16xf32> -> vector<8x16xf32>
    %220 = vector.broadcast %3 : vector<1x16xf32> to vector<8x16xf32>
    %221 = arith.addf %219, %220 : vector<8x16xf32>
    %222 = vector.shape_cast %221 : vector<8x16xf32> to vector<1x8x16xf32>
    %223 = arith.index_cast %c4_i32 : i32 to index
    %c0_99 = arith.constant 0 : index
    %c0_100 = arith.constant 0 : index
    %224 = vector.load %arg7[%223, %c0_99, %c0_100] : memref<8x8x16xf32, #tpu.memory_space<vmem>>, vector<1x8x16xf32>
    tpu.vector_store %arg7[%223, %c0_99, %c0_100], %222 {strides = array<i32>} : memref<8x8x16xf32, #tpu.memory_space<vmem>>, vector<1x8x16xf32>,
    %c5_i32 = arith.constant 5 : i32
    %225 = arith.index_cast %c5_i32 : i32 to index
    %c0_101 = arith.constant 0 : index
    %226 = memref.load %arg0[%225, %c0_101] : memref<8x8xi32, #tpu.memory_space<smem>>
    %227 = arith.index_cast %226 : i32 to index
    %c0_102 = arith.constant 0 : index
    %228 = vector.load %arg1[%227, %c0_102] : memref<16x32xf32, #tpu.memory_space<vmem>>, vector<1x32xf32>
    %229 = arith.index_cast %c5_i32 : i32 to index
    %c1_103 = arith.constant 1 : index
    %230 = memref.load %arg0[%229, %c1_103] : memref<8x8xi32, #tpu.memory_space<smem>>
    %231 = arith.index_cast %230 : i32 to index
    %c0_104 = arith.constant 0 : index
    %232 = vector.load %arg1[%231, %c0_104] : memref<16x32xf32, #tpu.memory_space<vmem>>, vector<1x32xf32>
    %233 = arith.index_cast %c5_i32 : i32 to index
    %c2_105 = arith.constant 2 : index
    %234 = memref.load %arg0[%233, %c2_105] : memref<8x8xi32, #tpu.memory_space<smem>>
    %235 = arith.index_cast %234 : i32 to index
    %c0_106 = arith.constant 0 : index
    %236 = vector.load %arg1[%235, %c0_106] : memref<16x32xf32, #tpu.memory_space<vmem>>, vector<1x32xf32>
    %237 = arith.index_cast %c5_i32 : i32 to index
    %c3_107 = arith.constant 3 : index
    %238 = memref.load %arg0[%237, %c3_107] : memref<8x8xi32, #tpu.memory_space<smem>>
    %239 = arith.index_cast %238 : i32 to index
    %c0_108 = arith.constant 0 : index
    %240 = vector.load %arg1[%239, %c0_108] : memref<16x32xf32, #tpu.memory_space<vmem>>, vector<1x32xf32>
    %241 = arith.index_cast %c5_i32 : i32 to index
    %c4_109 = arith.constant 4 : index
    %242 = memref.load %arg0[%241, %c4_109] : memref<8x8xi32, #tpu.memory_space<smem>>
    %243 = arith.index_cast %242 : i32 to index
    %c0_110 = arith.constant 0 : index
    %244 = vector.load %arg1[%243, %c0_110] : memref<16x32xf32, #tpu.memory_space<vmem>>, vector<1x32xf32>
    %245 = arith.index_cast %c5_i32 : i32 to index
    %c5_111 = arith.constant 5 : index
    %246 = memref.load %arg0[%245, %c5_111] : memref<8x8xi32, #tpu.memory_space<smem>>
    %247 = arith.index_cast %246 : i32 to index
    %c0_112 = arith.constant 0 : index
    %248 = vector.load %arg1[%247, %c0_112] : memref<16x32xf32, #tpu.memory_space<vmem>>, vector<1x32xf32>
    %249 = arith.index_cast %c5_i32 : i32 to index
    %c6_113 = arith.constant 6 : index
    %250 = memref.load %arg0[%249, %c6_113] : memref<8x8xi32, #tpu.memory_space<smem>>
    %251 = arith.index_cast %250 : i32 to index
    %c0_114 = arith.constant 0 : index
    %252 = vector.load %arg1[%251, %c0_114] : memref<16x32xf32, #tpu.memory_space<vmem>>, vector<1x32xf32>
    %253 = arith.index_cast %c5_i32 : i32 to index
    %c7_115 = arith.constant 7 : index
    %254 = memref.load %arg0[%253, %c7_115] : memref<8x8xi32, #tpu.memory_space<smem>>
    %255 = arith.index_cast %254 : i32 to index
    %c0_116 = arith.constant 0 : index
    %256 = vector.load %arg1[%255, %c0_116] : memref<16x32xf32, #tpu.memory_space<vmem>>, vector<1x32xf32>
    %257 = tpu.concatenate %228, %232, %236, %240, %244, %248, %252, %256 in 0 : vector<1x32xf32>, vector<1x32xf32>, vector<1x32xf32>, vector<1x32xf32>, vector<1x32xf32>, vector<1x32xf32>, vector<1x32xf32>, vector<1x32xf32> -> vector<8x32xf32>
    %258 = vector.broadcast %2 : vector<1x32xf32> to vector<8x32xf32>
    %259 = arith.addf %257, %258 : vector<8x32xf32>
    %cst_117 = arith.constant dense<0.000000e+00> : vector<8x32xf32>
    %260 = tpu.matmul %218, %0, %cst_117 {dimension_numbers = #tpu.dot_dimension_numbers<[1], [0], [0], [1], [0, 0, 1, 1], [], []>} : vector<8x32xf32>, vector<32x32xf32>, vector<8x32xf32> -> vector<8x32xf32>
    %261 = arith.addf %259, %260 : vector<8x32xf32>
    %262 = math.tanh %261 : vector<8x32xf32>
    %cst_118 = arith.constant dense<0.000000e+00> : vector<8x16xf32>
    %263 = tpu.matmul %262, %1, %cst_118 {dimension_numbers = #tpu.dot_dimension_numbers<[1], [0], [0], [1], [0, 0, 1, 1], [], []>} : vector<8x32xf32>, vector<32x16xf32>, vector<8x16xf32> -> vector<8x16xf32>
    %264 = vector.broadcast %3 : vector<1x16xf32> to vector<8x16xf32>
    %265 = arith.addf %263, %264 : vector<8x16xf32>
    %266 = vector.shape_cast %265 : vector<8x16xf32> to vector<1x8x16xf32>
    %267 = arith.index_cast %c5_i32 : i32 to index
    %c0_119 = arith.constant 0 : index
    %c0_120 = arith.constant 0 : index
    %268 = vector.load %arg7[%267, %c0_119, %c0_120] : memref<8x8x16xf32, #tpu.memory_space<vmem>>, vector<1x8x16xf32>
    tpu.vector_store %arg7[%267, %c0_119, %c0_120], %266 {strides = array<i32>} : memref<8x8x16xf32, #tpu.memory_space<vmem>>, vector<1x8x16xf32>,
    %c6_i32 = arith.constant 6 : i32
    %269 = arith.index_cast %c6_i32 : i32 to index
    %c0_121 = arith.constant 0 : index
    %270 = memref.load %arg0[%269, %c0_121] : memref<8x8xi32, #tpu.memory_space<smem>>
    %271 = arith.index_cast %270 : i32 to index
    %c0_122 = arith.constant 0 : index
    %272 = vector.load %arg1[%271, %c0_122] : memref<16x32xf32, #tpu.memory_space<vmem>>, vector<1x32xf32>
    %273 = arith.index_cast %c6_i32 : i32 to index
    %c1_123 = arith.constant 1 : index
    %274 = memref.load %arg0[%273, %c1_123] : memref<8x8xi32, #tpu.memory_space<smem>>
    %275 = arith.index_cast %274 : i32 to index
    %c0_124 = arith.constant 0 : index
    %276 = vector.load %arg1[%275, %c0_124] : memref<16x32xf32, #tpu.memory_space<vmem>>, vector<1x32xf32>
    %277 = arith.index_cast %c6_i32 : i32 to index
    %c2_125 = arith.constant 2 : index
    %278 = memref.load %arg0[%277, %c2_125] : memref<8x8xi32, #tpu.memory_space<smem>>
    %279 = arith.index_cast %278 : i32 to index
    %c0_126 = arith.constant 0 : index
    %280 = vector.load %arg1[%279, %c0_126] : memref<16x32xf32, #tpu.memory_space<vmem>>, vector<1x32xf32>
    %281 = arith.index_cast %c6_i32 : i32 to index
    %c3_127 = arith.constant 3 : index
    %282 = memref.load %arg0[%281, %c3_127] : memref<8x8xi32, #tpu.memory_space<smem>>
    %283 = arith.index_cast %282 : i32 to index
    %c0_128 = arith.constant 0 : index
    %284 = vector.load %arg1[%283, %c0_128] : memref<16x32xf32, #tpu.memory_space<vmem>>, vector<1x32xf32>
    %285 = arith.index_cast %c6_i32 : i32 to index
    %c4_129 = arith.constant 4 : index
    %286 = memref.load %arg0[%285, %c4_129] : memref<8x8xi32, #tpu.memory_space<smem>>
    %287 = arith.index_cast %286 : i32 to index
    %c0_130 = arith.constant 0 : index
    %288 = vector.load %arg1[%287, %c0_130] : memref<16x32xf32, #tpu.memory_space<vmem>>, vector<1x32xf32>
    %289 = arith.index_cast %c6_i32 : i32 to index
    %c5_131 = arith.constant 5 : index
    %290 = memref.load %arg0[%289, %c5_131] : memref<8x8xi32, #tpu.memory_space<smem>>
    %291 = arith.index_cast %290 : i32 to index
    %c0_132 = arith.constant 0 : index
    %292 = vector.load %arg1[%291, %c0_132] : memref<16x32xf32, #tpu.memory_space<vmem>>, vector<1x32xf32>
    %293 = arith.index_cast %c6_i32 : i32 to index
    %c6_133 = arith.constant 6 : index
    %294 = memref.load %arg0[%293, %c6_133] : memref<8x8xi32, #tpu.memory_space<smem>>
    %295 = arith.index_cast %294 : i32 to index
    %c0_134 = arith.constant 0 : index
    %296 = vector.load %arg1[%295, %c0_134] : memref<16x32xf32, #tpu.memory_space<vmem>>, vector<1x32xf32>
    %297 = arith.index_cast %c6_i32 : i32 to index
    %c7_135 = arith.constant 7 : index
    %298 = memref.load %arg0[%297, %c7_135] : memref<8x8xi32, #tpu.memory_space<smem>>
    %299 = arith.index_cast %298 : i32 to index
    %c0_136 = arith.constant 0 : index
    %300 = vector.load %arg1[%299, %c0_136] : memref<16x32xf32, #tpu.memory_space<vmem>>, vector<1x32xf32>
    %301 = tpu.concatenate %272, %276, %280, %284, %288, %292, %296, %300 in 0 : vector<1x32xf32>, vector<1x32xf32>, vector<1x32xf32>, vector<1x32xf32>, vector<1x32xf32>, vector<1x32xf32>, vector<1x32xf32>, vector<1x32xf32> -> vector<8x32xf32>
    %302 = vector.broadcast %2 : vector<1x32xf32> to vector<8x32xf32>
    %303 = arith.addf %301, %302 : vector<8x32xf32>
    %cst_137 = arith.constant dense<0.000000e+00> : vector<8x32xf32>
    %304 = tpu.matmul %262, %0, %cst_137 {dimension_numbers = #tpu.dot_dimension_numbers<[1], [0], [0], [1], [0, 0, 1, 1], [], []>} : vector<8x32xf32>, vector<32x32xf32>, vector<8x32xf32> -> vector<8x32xf32>
    %305 = arith.addf %303, %304 : vector<8x32xf32>
    %306 = math.tanh %305 : vector<8x32xf32>
    %cst_138 = arith.constant dense<0.000000e+00> : vector<8x16xf32>
    %307 = tpu.matmul %306, %1, %cst_138 {dimension_numbers = #tpu.dot_dimension_numbers<[1], [0], [0], [1], [0, 0, 1, 1], [], []>} : vector<8x32xf32>, vector<32x16xf32>, vector<8x16xf32> -> vector<8x16xf32>
    %308 = vector.broadcast %3 : vector<1x16xf32> to vector<8x16xf32>
    %309 = arith.addf %307, %308 : vector<8x16xf32>
    %310 = vector.shape_cast %309 : vector<8x16xf32> to vector<1x8x16xf32>
    %311 = arith.index_cast %c6_i32 : i32 to index
    %c0_139 = arith.constant 0 : index
    %c0_140 = arith.constant 0 : index
    %312 = vector.load %arg7[%311, %c0_139, %c0_140] : memref<8x8x16xf32, #tpu.memory_space<vmem>>, vector<1x8x16xf32>
    tpu.vector_store %arg7[%311, %c0_139, %c0_140], %310 {strides = array<i32>} : memref<8x8x16xf32, #tpu.memory_space<vmem>>, vector<1x8x16xf32>,
    %c7_i32 = arith.constant 7 : i32
    %313 = arith.index_cast %c7_i32 : i32 to index
    %c0_141 = arith.constant 0 : index
    %314 = memref.load %arg0[%313, %c0_141] : memref<8x8xi32, #tpu.memory_space<smem>>
    %315 = arith.index_cast %314 : i32 to index
    %c0_142 = arith.constant 0 : index
    %316 = vector.load %arg1[%315, %c0_142] : memref<16x32xf32, #tpu.memory_space<vmem>>, vector<1x32xf32>
    %317 = arith.index_cast %c7_i32 : i32 to index
    %c1_143 = arith.constant 1 : index
    %318 = memref.load %arg0[%317, %c1_143] : memref<8x8xi32, #tpu.memory_space<smem>>
    %319 = arith.index_cast %318 : i32 to index
    %c0_144 = arith.constant 0 : index
    %320 = vector.load %arg1[%319, %c0_144] : memref<16x32xf32, #tpu.memory_space<vmem>>, vector<1x32xf32>
    %321 = arith.index_cast %c7_i32 : i32 to index
    %c2_145 = arith.constant 2 : index
    %322 = memref.load %arg0[%321, %c2_145] : memref<8x8xi32, #tpu.memory_space<smem>>
    %323 = arith.index_cast %322 : i32 to index
    %c0_146 = arith.constant 0 : index
    %324 = vector.load %arg1[%323, %c0_146] : memref<16x32xf32, #tpu.memory_space<vmem>>, vector<1x32xf32>
    %325 = arith.index_cast %c7_i32 : i32 to index
    %c3_147 = arith.constant 3 : index
    %326 = memref.load %arg0[%325, %c3_147] : memref<8x8xi32, #tpu.memory_space<smem>>
    %327 = arith.index_cast %326 : i32 to index
    %c0_148 = arith.constant 0 : index
    %328 = vector.load %arg1[%327, %c0_148] : memref<16x32xf32, #tpu.memory_space<vmem>>, vector<1x32xf32>
    %329 = arith.index_cast %c7_i32 : i32 to index
    %c4_149 = arith.constant 4 : index
    %330 = memref.load %arg0[%329, %c4_149] : memref<8x8xi32, #tpu.memory_space<smem>>
    %331 = arith.index_cast %330 : i32 to index
    %c0_150 = arith.constant 0 : index
    %332 = vector.load %arg1[%331, %c0_150] : memref<16x32xf32, #tpu.memory_space<vmem>>, vector<1x32xf32>
    %333 = arith.index_cast %c7_i32 : i32 to index
    %c5_151 = arith.constant 5 : index
    %334 = memref.load %arg0[%333, %c5_151] : memref<8x8xi32, #tpu.memory_space<smem>>
    %335 = arith.index_cast %334 : i32 to index
    %c0_152 = arith.constant 0 : index
    %336 = vector.load %arg1[%335, %c0_152] : memref<16x32xf32, #tpu.memory_space<vmem>>, vector<1x32xf32>
    %337 = arith.index_cast %c7_i32 : i32 to index
    %c6_153 = arith.constant 6 : index
    %338 = memref.load %arg0[%337, %c6_153] : memref<8x8xi32, #tpu.memory_space<smem>>
    %339 = arith.index_cast %338 : i32 to index
    %c0_154 = arith.constant 0 : index
    %340 = vector.load %arg1[%339, %c0_154] : memref<16x32xf32, #tpu.memory_space<vmem>>, vector<1x32xf32>
    %341 = arith.index_cast %c7_i32 : i32 to index
    %c7_155 = arith.constant 7 : index
    %342 = memref.load %arg0[%341, %c7_155] : memref<8x8xi32, #tpu.memory_space<smem>>
    %343 = arith.index_cast %342 : i32 to index
    %c0_156 = arith.constant 0 : index
    %344 = vector.load %arg1[%343, %c0_156] : memref<16x32xf32, #tpu.memory_space<vmem>>, vector<1x32xf32>
    %345 = tpu.concatenate %316, %320, %324, %328, %332, %336, %340, %344 in 0 : vector<1x32xf32>, vector<1x32xf32>, vector<1x32xf32>, vector<1x32xf32>, vector<1x32xf32>, vector<1x32xf32>, vector<1x32xf32>, vector<1x32xf32> -> vector<8x32xf32>
    %346 = vector.broadcast %2 : vector<1x32xf32> to vector<8x32xf32>
    %347 = arith.addf %345, %346 : vector<8x32xf32>
    %cst_157 = arith.constant dense<0.000000e+00> : vector<8x32xf32>
    %348 = tpu.matmul %306, %0, %cst_157 {dimension_numbers = #tpu.dot_dimension_numbers<[1], [0], [0], [1], [0, 0, 1, 1], [], []>} : vector<8x32xf32>, vector<32x32xf32>, vector<8x32xf32> -> vector<8x32xf32>
    %349 = arith.addf %347, %348 : vector<8x32xf32>
    %350 = math.tanh %349 : vector<8x32xf32>
    %cst_158 = arith.constant dense<0.000000e+00> : vector<8x16xf32>
    %351 = tpu.matmul %350, %1, %cst_158 {dimension_numbers = #tpu.dot_dimension_numbers<[1], [0], [0], [1], [0, 0, 1, 1], [], []>} : vector<8x32xf32>, vector<32x16xf32>, vector<8x16xf32> -> vector<8x16xf32>
    %352 = vector.broadcast %3 : vector<1x16xf32> to vector<8x16xf32>
    %353 = arith.addf %351, %352 : vector<8x16xf32>
    %354 = vector.shape_cast %353 : vector<8x16xf32> to vector<1x8x16xf32>
    %355 = arith.index_cast %c7_i32 : i32 to index
    %c0_159 = arith.constant 0 : index
    %c0_160 = arith.constant 0 : index
    %356 = vector.load %arg7[%355, %c0_159, %c0_160] : memref<8x8x16xf32, #tpu.memory_space<vmem>>, vector<1x8x16xf32>
    tpu.vector_store %arg7[%355, %c0_159, %c0_160], %354 {strides = array<i32>} : memref<8x8x16xf32, #tpu.memory_space<vmem>>, vector<1x8x16xf32>,
    %c8_i32 = arith.constant 8 : i32
    %c0_161 = arith.constant 0 : index
    %c0_162 = arith.constant 0 : index
    %357 = vector.load %arg8[%c0_161, %c0_162] : memref<8x32xf32, #tpu.memory_space<vmem>>, vector<8x32xf32>
    tpu.vector_store %arg8[%c0_161, %c0_162], %350 {strides = array<i32>} : memref<8x32xf32, #tpu.memory_space<vmem>>, vector<8x32xf32>,
    return
  }
}

</mosaic_0001>

<bundles_post_ra>
// kernel: one_hot_rnn_forward.1
= control target key start
LH: loop header
LB: loop body
LE: loop exit
PB: predicated region body
PF: predicated region fallthrough
CT: control target
= control target key end

     0   :  { %14 = vsyncpa [#allocation4], 0  ;;  %s1594_s0 = inlined_call_operand.vmem [shape: s32[8,8], index: 0, kind: input, shape index: {}]   ;;  %s1595_s1 = inlined_call_operand.vmem [shape: f32[16,32], index: 1, kind: input, shape index: {}]   ;;  %s1596_s2 = inlined_call_operand.vmem [shape: f32[32,32], index: 2, kind: input, shape index: {}]   ;;  %s1597_s3 = inlined_call_operand.vmem [shape: f32[1,32], index: 3, kind: input, shape index: {}]   ;;  %s1598_s4 = inlined_call_operand.vmem [shape: f32[32,16], index: 4, kind: input, shape index: {}]   ;;  %s1599_s5 = inlined_call_operand.vmem [shape: f32[1,16], index: 5, kind: input, shape index: {}]   ;;  %s1600_s6 = inlined_call_operand.vmem [shape: f32[8,32], index: 6, kind: input, shape index: {}]   ;;  %s1601_s7 = inlined_call_operand.vmem [shape: f32[8,8,16], index: 7, kind: output, shape index: {0}]   ;;  %s1602_s8 = inlined_call_operand.hbm [shape: f32[8,32], index: 8, kind: output, shape index: {1}]  }
   0x1   :  { %15 = vsyncpa [#allocation3], 0  ;;  %s21_s29 = sshll.u32 %s1594_s0, 4  ;;  %s1102_s30 = smov [#allocation2]   ;;  %s22_s29 = int_to_ptr.vmem [resolvable:$true] %s21_s29 }
   0x2   :  { %24 = dma.vmem_to_smem %s22_s29, 128, %s1102_s30, [#allocation4]  }
   0x3   :  { %1098 = dma.done.wait [#allocation4], 128  }
   0x4   :  { %1099 = vsyncadd [#allocation4], 4294967168 }
   0x5   :  { %41 = sfence }
   0x6   :  { %v1155_v0 = vld [vmem:[%s1596_s2 + $0x18] sm:$0xff]  ;;  %v1160_v1 = vld [vmem:[%s1596_s2 + $0x10] sm:$0xff]  ;;  %v1167_v2 = vld [vmem:[%s1596_s2 + $0x8] sm:$0xff]  ;;  %vm116_vm0 = vcmask 261120   ;;  %s53_s18 = sld [smem:[#allocation2]]  ;;  %vm98_vm1 = vcmask 1040384  }
   0x7   :  { %132 = vmatpush.msra.mxu0 %v1155_v0  ;;  %235 = vmatpush.msra.mxu2 %v1155_v0  ;;  %v1174_v3 = vld [vmem:[%s1596_s2] sm:$0xff]  ;;  %s956_s2 = sld [smem:[#allocation2 + $0x1]]  ;;  %v1212_v6 = vld [vmem:[%s1598_s4 + $0x18] sm:$0xff]  ;;  %v1218_v7 = vld [vmem:[%s1598_s4 + $0x10] sm:$0xff]  ;;  %vm100_vm2 = vcmask 1041408   ;;  %vm102_vm3 = vcmask 1042432  }
   0x8   :  { %v52_v4 = vld [vmem:[%s1600_s6] sm:$0xff]  ;;  %s957_s6 = sld [smem:[#allocation2 + $0x2]]  ;;  %160 = vmatpush.msra.mxu1 %v1212_v6  ;;  %260 = vmatpush.msra.mxu3 %v1212_v6  ;;  %v1227_v10 = vld [vmem:[%s1598_s4 + $0x8] sm:$0xff]  ;;  %vm104_vm4 = vcmask 1043456   ;;  %vm106_vm5 = vcmask 1044480   ;;  %vm108_vm6 = vcmask 1045504  }
   0x9   :  { %133 = vmatpush.msra.mxu0 %v1160_v1  ;;  %236 = vmatpush.msra.mxu2 %v1160_v1  ;;  %s958_s19 = sld [smem:[#allocation2 + $0x3]]  ;;  %v1236_v12 = vld [vmem:[%s1598_s4] sm:$0xff]  ;;  %vm110_vm7 = vcmask 1046528   ;;  %vm168_vm8 = vcmask 130048  }
   0xa   :  { %s1199_s23 = sld [smem:[#allocation2 + $0x4]]  ;;  %161 = vmatpush.msra.mxu1 %v1218_v7  ;;  %261 = vmatpush.msra.mxu3 %v1218_v7  ;;  %v1274_v30 = vld [vmem:[%s1597_s3] ss:$0 sm:$0xff] }
   0xb   :  { %134 = vmatpush.msra.mxu0 %v1167_v2  ;;  %237 = vmatpush.msra.mxu2 %v1167_v2  ;;  %s1207_s30 = sld [smem:[#allocation2 + $0x5]]  ;;  %v1320_v56 = vld [vmem:[%s1599_s5] ss:$0 sm:$0xff] }
   0xc   :  { %s54_s29 = scalar_lea.vmem %s1595_s1, %s53_s18  ;;  %s1229_s17 = sld [smem:[#allocation2 + $0x6]]  ;;  %162 = vmatpush.msra.mxu1 %v1227_v10  ;;  %262 = vmatpush.msra.mxu3 %v1227_v10 }
   0xd   :  { %135 = vmatpush.msra.mxu0 %v1174_v3  ;;  %238 = vmatpush.msra.mxu2 %v1174_v3  ;;  %s57_s22 = scalar_lea.vmem %s1595_s1, %s956_s2  ;;  %v55_v11 = vld [vmem:[%s54_s29] sm:$0x1]  ;;  %s962_s21 = sld [smem:[#allocation2 + $0x7]] }
   0xe   :  { %963 = vmatmul.msk.f32.vlgmr.msra.gmra.mxu0 %vm116_vm0, %v52_v4  ;;  %v58_v5 = vld [vmem:[%s57_s22] sm:$0x1]  ;;  %s60_s26 = scalar_lea.vmem %s1595_s1, %s957_s6  ;;  %163 = vmatpush.msra.mxu1 %v1236_v12  ;;  %s966_s3 = sld [smem:[#allocation2 + $0x81]] }
   0xf   :  { %435 = vmatpush.msrb.mxu2 %v1155_v0  ;;  %335 = vmatpush.msrb.mxu0 %v1155_v0  ;;  %v61_v8 = vld [vmem:[%s60_s26] sm:$0x1]  ;;  %s63_s14 = scalar_lea.vmem %s1595_s1, %s958_s19  ;;  %v78_v9 = vrot.slane %v58_v5, 7  ;;  %s967_s10 = sld [smem:[#allocation2 + $0x82]] }
  0x10   :  { %v64_v13 = vld [vmem:[%s63_s14] sm:$0x1]  ;;  %s66_s20 = scalar_lea.vmem %s1595_s1, %s1199_s23  ;;  %v81_v14 = vrot.slane %v61_v8, 6  ;;  %263 = vmatpush.msra.mxu3 %v1236_v12  ;;  %360 = vmatpush.msrb.mxu1 %v1212_v6  ;;  %s965_s11 = sld [smem:[#allocation2 + $0x80]] }
  0x11   :  { %436 = vmatpush.msrb.mxu2 %v1160_v1  ;;  %336 = vmatpush.msrb.mxu0 %v1160_v1  ;;  %v99_v15 = vsel %vm98_vm1, %v55_v11, %v78_v9  ;;  %v67_v16 = vld [vmem:[%s66_s20] sm:$0x1]  ;;  %s69_s24 = scalar_lea.vmem %s1595_s1, %s1207_s30  ;;  %v84_v17 = vrot.slane %v64_v13, 5  ;;  %s968_s12 = sld [smem:[#allocation2 + $0x83]] }
  0x12   :  { %460 = vmatpush.msrb.mxu3 %v1212_v6  ;;  %v101_v18 = vsel %vm100_vm2, %v99_v15, %v81_v14  ;;  %361 = vmatpush.msrb.mxu1 %v1218_v7  ;;  %v70_v19 = vld [vmem:[%s69_s24] sm:$0x1]  ;;  %s72_s26 = scalar_lea.vmem %s1595_s1, %s1229_s17  ;;  %v87_v20 = vrot.slane %v67_v16, 4  ;;  %s969_s15 = sld [smem:[#allocation2 + $0x84]] }
  0x13   :  { %437 = vmatpush.msrb.mxu2 %v1167_v2  ;;  %337 = vmatpush.msrb.mxu0 %v1167_v2  ;;  %v103_v21 = vsel %vm102_vm3, %v101_v18, %v84_v17  ;;  %v73_v22 = vld [vmem:[%s72_s26] sm:$0x1]  ;;  %s75_s29 = scalar_lea.vmem %s1595_s1, %s962_s21  ;;  %v90_v23 = vrot.slane %v70_v19, 3  ;;  %s970_s20 = sld [smem:[#allocation2 + $0x85]] }
  0x14   :  { %461 = vmatpush.msrb.mxu3 %v1218_v7  ;;  %362 = vmatpush.msrb.mxu1 %v1227_v10  ;;  %v105_v24 = vsel %vm104_vm4, %v103_v21, %v87_v20  ;;  %v76_v25 = vld [vmem:[%s75_s29] sm:$0x1]  ;;  %v93_v26 = vrot.slane %v73_v22, 2  ;;  %s174_s14 = scalar_lea.vmem %s1595_s1, %s966_s3  ;;  %s971_s24 = sld [smem:[#allocation2 + $0x86]] }
  0x15   :  { %438 = vmatpush.msrb.mxu2 %v1174_v3  ;;  %338 = vmatpush.msrb.mxu0 %v1174_v3  ;;  %v107_v27 = vsel %vm106_vm5, %v105_v24, %v90_v23  ;;  %v96_v28 = vrot.slane %v76_v25, 1  ;;  %v175_v36 = vld [vmem:[%s174_s14] sm:$0x1]  ;;  %s177_s2 = scalar_lea.vmem %s1595_s1, %s967_s10  ;;  %s972_s27 = sld [smem:[#allocation2 + $0x87]] }
  0x16   :  { %462 = vmatpush.msrb.mxu3 %v1227_v10  ;;  %363 = vmatpush.msrb.mxu1 %v1236_v12  ;;  %v109_v29 = vsel %vm108_vm6, %v107_v27, %v93_v26  ;;  %s171_s19 = scalar_lea.vmem %s1595_s1, %s965_s11  ;;  %v178_v37 = vld [vmem:[%s177_s2] sm:$0x1]  ;;  %v195_v38 = vrot.slane %v175_v36, 7  ;;  %s977_s5 = sld [smem:[#allocation2 + $0x101]] }
  0x17   :  { %535 = vmatpush.msra.mxu0 %v1155_v0  ;;  %v111_v31 = vsel %vm110_vm7, %v109_v29, %v96_v28  ;;  %s180_s22 = scalar_lea.vmem %s1595_s1, %s968_s12  ;;  %v172_v39 = vld [vmem:[%s171_s19] sm:$0x1]  ;;  %v198_v41 = vrot.slane %v178_v37, 6  ;;  %s978_s17 = sld [smem:[#allocation2 + $0x102]] }
  0x18   :  { %463 = vmatpush.msrb.mxu3 %v1236_v12  ;;  %v115_v32 = vadd.f32 %v1274_v30, %v111_v31  ;;  %v181_v40 = vld [vmem:[%s180_s22] sm:$0x1]  ;;  %s183_s26 = scalar_lea.vmem %s1595_s1, %s969_s15  ;;  %v215_v42 = vsel %vm98_vm1, %v172_v39, %v195_v38  ;;  %s976_s2 = sld [smem:[#allocation2 + $0x100]] }
  0x19   :  { %536 = vmatpush.msra.mxu0 %v1160_v1  ;;  %v184_v43 = vld [vmem:[%s183_s26] sm:$0x1]  ;;  %s186_s30 = scalar_lea.vmem %s1595_s1, %s970_s20  ;;  %v201_v44 = vrot.slane %v181_v40, 5  ;;  %v216_v45 = vsel %vm100_vm2, %v215_v42, %v198_v41  ;;  %s979_s6 = sld [smem:[#allocation2 + $0x103]] }
  0x1a   :  { %v187_v46 = vld [vmem:[%s186_s30] sm:$0x1]  ;;  %s189_s10 = scalar_lea.vmem %s1595_s1, %s971_s24  ;;  %v204_v47 = vrot.slane %v184_v43, 4  ;;  %s980_s21 = sld [smem:[#allocation2 + $0x104]] }
  0x1b   :  { %537 = vmatpush.msra.mxu0 %v1167_v2  ;;  %v217_v48 = vsel %vm102_vm3, %v216_v45, %v201_v44  ;;  %v190_v49 = vld [vmem:[%s189_s10] sm:$0x1]  ;;  %s192_s0 = scalar_lea.vmem %s1595_s1, %s972_s27  ;;  %v207_v50 = vrot.slane %v187_v46, 3  ;;  %s981_s27 = sld [smem:[#allocation2 + $0x105]] }
  0x1c   :  { %v218_v51 = vsel %vm104_vm4, %v217_v48, %v204_v47  ;;  %v193_v52 = vld [vmem:[%s192_s0] sm:$0x1]  ;;  %v210_v53 = vrot.slane %v190_v49, 2  ;;  %s274_s20 = scalar_lea.vmem %s1595_s1, %s977_s5  ;;  %s982_s9 = sld [smem:[#allocation2 + $0x106]] }
  0x1d   :  { %538 = vmatpush.msra.mxu0 %v1174_v3  ;;  %v219_v54 = vsel %vm106_vm5, %v218_v51, %v207_v50  ;;  %v213_v55 = vrot.slane %v193_v52, 1  ;;  %v275_v5 = vld [vmem:[%s274_s20] sm:$0x1]  ;;  %s277_s24 = scalar_lea.vmem %s1595_s1, %s978_s17  ;;  %s983_s12 = sld [smem:[#allocation2 + $0x107]] }
  0x1e   :  { %v220_v57 = vsel %vm108_vm6, %v219_v54, %v210_v53  ;;  %s271_s26 = scalar_lea.vmem %s1595_s1, %s976_s2  ;;  %v278_v8 = vld [vmem:[%s277_s24] sm:$0x1]  ;;  %v295_v9 = vrot.slane %v275_v5, 7  ;;  %s988_s20 = sld [smem:[#allocation2 + $0x181]] }
  0x1f   :  { %v221_v59 = vsel %vm110_vm7, %v220_v57, %v213_v55  ;;  %s280_s30 = scalar_lea.vmem %s1595_s1, %s979_s6  ;;  %v272_v11 = vld [vmem:[%s271_s26] sm:$0x1]  ;;  %v298_v14 = vrot.slane %v278_v8, 6  ;;  %s987_s4 = sld [smem:[#allocation2 + $0x180]] }
  0x20   :  { %v222_v61 = vadd.f32 %v1274_v30, %v221_v59  ;;  %v281_v13 = vld [vmem:[%s280_s30] sm:$0x1]  ;;  %s283_s11 = scalar_lea.vmem %s1595_s1, %s980_s21  ;;  %v315_v15 = vsel %vm98_vm1, %v272_v11, %v295_v9  ;;  %s989_s21 = sld [smem:[#allocation2 + $0x182]] }
  0x21   :  { %v284_v16 = vld [vmem:[%s283_s11] sm:$0x1]  ;;  %s286_s14 = scalar_lea.vmem %s1595_s1, %s981_s27  ;;  %v301_v17 = vrot.slane %v281_v13, 5  ;;  %v316_v18 = vsel %vm100_vm2, %v315_v15, %v298_v14  ;;  %s990_s22 = sld [smem:[#allocation2 + $0x183]] }
  0x22   :  { %v287_v19 = vld [vmem:[%s286_s14] sm:$0x1]  ;;  %s289_s5 = scalar_lea.vmem %s1595_s1, %s982_s9  ;;  %v304_v20 = vrot.slane %v284_v16, 4  ;;  %s991_s26 = sld [smem:[#allocation2 + $0x184]] }
  0x23   :  { %v317_v21 = vsel %vm102_vm3, %v316_v18, %v301_v17  ;;  %v290_v22 = vld [vmem:[%s289_s5] sm:$0x1]  ;;  %s292_s6 = scalar_lea.vmem %s1595_s1, %s983_s12  ;;  %v307_v23 = vrot.slane %v287_v19, 3  ;;  %s992_s10 = sld [smem:[#allocation2 + $0x185]] }
  0x24   :  { %v318_v24 = vsel %vm104_vm4, %v317_v21, %v304_v20  ;;  %v293_v25 = vld [vmem:[%s292_s6] sm:$0x1]  ;;  %v310_v26 = vrot.slane %v290_v22, 2  ;;  %s374_s25 = scalar_lea.vmem %s1595_s1, %s988_s20  ;;  %s993_s13 = sld [smem:[#allocation2 + $0x186]] }
  0x25   :  { %v319_v27 = vsel %vm106_vm5, %v318_v24, %v307_v23  ;;  %v313_v28 = vrot.slane %v293_v25, 1  ;;  %s371_s3 = scalar_lea.vmem %s1595_s1, %s987_s4  ;;  %s994_s5 = sld [smem:[#allocation2 + $0x187]] }
  0x26   :  { %v320_v29 = vsel %vm108_vm6, %v319_v27, %v310_v26  ;;  %s377_s29 = scalar_lea.vmem %s1595_s1, %s989_s21  ;;  %s998_s27 = sld [smem:[#allocation2 + $0x200]] }
  0x27   :  { %v321_v31 = vsel %vm110_vm7, %v320_v29, %v313_v28  ;;  %s380_s0 = scalar_lea.vmem %s1595_s1, %s990_s22  ;;  %s1001_s28 = sld [smem:[#allocation2 + $0x203]] }
  0x28   :  { %v381_v38 = vld [vmem:[%s380_s0] sm:$0x1]  ;;  %s383_s16 = scalar_lea.vmem %s1595_s1, %s991_s26  ;;  %s1000_s26 = sld [smem:[#allocation2 + $0x202]] }
  0x29   :  { %v384_v41 = vld [vmem:[%s383_s16] sm:$0x1]  ;;  %s386_s6 = scalar_lea.vmem %s1595_s1, %s992_s10  ;;  %v401_v42 = vrot.slane %v381_v38, 5  ;;  %s1003_s15 = sld [smem:[#allocation2 + $0x205]] }
  0x2a   :  { %v387_v44 = vld [vmem:[%s386_s6] sm:$0x1]  ;;  %s389_s20 = scalar_lea.vmem %s1595_s1, %s993_s13  ;;  %v404_v45 = vrot.slane %v384_v41, 4  ;;  %s1004_s2 = sld [smem:[#allocation2 + $0x206]] }
  0x2b   :  { %v390_v47 = vld [vmem:[%s389_s20] sm:$0x1]  ;;  %s392_s22 = scalar_lea.vmem %s1595_s1, %s994_s5  ;;  %v407_v48 = vrot.slane %v387_v44, 3  ;;  %s1005_s20 = sld [smem:[#allocation2 + $0x207]] }
  0x2c   :  { %v393_v50 = vld [vmem:[%s392_s22] sm:$0x1]  ;;  %v410_v51 = vrot.slane %v390_v47, 2  ;;  %s471_s14 = scalar_lea.vmem %s1595_s1, %s998_s27  ;;  %s1009_s10 = sld [smem:[#allocation2 + $0x280]] }
  0x2d   :  { %v413_v53 = vrot.slane %v393_v50, 1  ;;  %s480_s17 = scalar_lea.vmem %s1595_s1, %s1001_s28  ;;  %s1012_s11 = sld [smem:[#allocation2 + $0x283]] }
  0x2e   :  { %s477_s12 = scalar_lea.vmem %s1595_s1, %s1000_s26  ;;  %s1014_s18 = sld [smem:[#allocation2 + $0x285]] }
  0x2f   :  { %s486_s22 = scalar_lea.vmem %s1595_s1, %s1003_s15  ;;  %s1015_s4 = sld [smem:[#allocation2 + $0x286]] }
  0x30   :  { %v487_v13 = vld [vmem:[%s486_s22] sm:$0x1]  ;;  %s1020_s15 = sld [smem:[#allocation2 + $0x300]] }
  0x31   :  { %s492_s28 = scalar_lea.vmem %s1595_s1, %s1005_s20  ;;  %v507_v17 = vrot.slane %v487_v13, 3  ;;  %s1023_s16 = sld [smem:[#allocation2 + $0x303]] }
  0x32   :  { %v493_v19 = vld [vmem:[%s492_s28] sm:$0x1]  ;;  %s571_s6 = scalar_lea.vmem %s1595_s1, %s1009_s10  ;;  %s1025_s24 = sld [smem:[#allocation2 + $0x305]] }
  0x33   :  { %v513_v22 = vrot.slane %v493_v19, 1  ;;  %s580_s21 = scalar_lea.vmem %s1595_s1, %s1012_s11  ;;  %s1026_s27 = sld [smem:[#allocation2 + $0x306]] }
  0x34   :  { %s586_s28 = scalar_lea.vmem %s1595_s1, %s1014_s18  ;;  %s1031_s18 = sld [smem:[#allocation2 + $0x380]] }
  0x35   :  { %v587_v38 = vld [vmem:[%s586_s28] sm:$0x1]  ;;  %s1037_s10 = sld [smem:[#allocation2 + $0x386]] }
  0x36   :  { %s671_s22 = scalar_lea.vmem %s1595_s1, %s1020_s15 }
  0x37   :  { %s680_s26 = scalar_lea.vmem %s1595_s1, %s1023_s16 }
  0x3a   :  { %s771_s28 = scalar_lea.vmem %s1595_s1, %s1031_s18 }
  0x8b   :  { %v137_v33 = vpop.f32.mrf.mxu0 }
  0x8c   :  { %v140_v34 = vadd.f32 %v137_v33, %v115_v32  ;;  %v322_v32 = vadd.f32 %v1274_v30, %v321_v31 }
  0x8e   :  { %1046 = vtanh.f32 %v140_v34 }
  0x94   :  { %v1047_v35 = vpop.eup %1046 }
  0x95   :  { %964 = vmatmul.msk.f32.vlgmr.msra.gmra.mxu1 %vm116_vm0, %v1047_v35  ;;  %973 = vmatmul.msk.f32.vlgmr.msra.gmra.mxu2 %vm116_vm0, %v1047_v35 }
  0x96   :  { %635 = vmatpush.msra.mxu2 %v1155_v0  ;;  %560 = vmatpush.msra.mxu1 %v1212_v6 }
  0x98   :  { %636 = vmatpush.msra.mxu2 %v1160_v1  ;;  %561 = vmatpush.msra.mxu1 %v1218_v7 }
  0x9a   :  { %637 = vmatpush.msra.mxu2 %v1167_v2  ;;  %562 = vmatpush.msra.mxu1 %v1227_v10 }
  0x9c   :  { %638 = vmatpush.msra.mxu2 %v1174_v3  ;;  %563 = vmatpush.msra.mxu1 %v1236_v12 }
 0x112   :  { %v165_v58 = vpop.f32.mrf.mxu1 }
 0x113   :  { %v166_v60 = vadd.f32 %v1320_v56, %v165_v58 }
 0x115   :  { %169 = vst.msk [vmem:[%s1601_s7] sm:$0xff] %vm168_vm8, %v166_v60 }
 0x118   :  { %v240_v62 = vpop.f32.mrf.mxu2 }
 0x119   :  { %v243_v63 = vadd.f32 %v240_v62, %v222_v61 }
 0x11b   :  { %1048 = vtanh.f32 %v243_v63 }
 0x121   :  { %v1049_v4 = vpop.eup %1048 }
 0x122   :  { %974 = vmatmul.msk.f32.vlgmr.msra.gmra.mxu3 %vm116_vm0, %v1049_v4  ;;  %984 = vmatmul.msk.f32.vlgmr.msrb.gmra.mxu0 %vm116_vm0, %v1049_v4 }
 0x123   :  { %735 = vmatpush.msrb.mxu0 %v1155_v0  ;;  %660 = vmatpush.msra.mxu3 %v1212_v6 }
 0x125   :  { %736 = vmatpush.msrb.mxu0 %v1160_v1  ;;  %661 = vmatpush.msra.mxu3 %v1218_v7 }
 0x127   :  { %737 = vmatpush.msrb.mxu0 %v1167_v2  ;;  %662 = vmatpush.msra.mxu3 %v1227_v10 }
 0x129   :  { %738 = vmatpush.msrb.mxu0 %v1174_v3  ;;  %663 = vmatpush.msra.mxu3 %v1236_v12 }
 0x19f   :  { %v340_v33 = vpop.f32.mrf.mxu0 }
 0x1a0   :  { %v343_v34 = vadd.f32 %v340_v33, %v322_v32 }
 0x1a2   :  { %1050 = vtanh.f32 %v343_v34 }
 0x1a5   :  { %v265_v35 = vpop.f32.mrf.mxu3 }
 0x1a6   :  { %v266_v36 = vadd.f32 %v1320_v56, %v265_v35  ;;  %v572_v35 = vld [vmem:[%s571_s6] sm:$0x1]  ;;  %s1024_s6 = sld [smem:[#allocation2 + $0x304]] }
 0x1a8   :  { %v1051_v37 = vpop.eup %1050  ;;  %975 = vst.msk [vmem:[%s1601_s7 + $0x8] sm:$0xff] %vm168_vm8, %v266_v36  ;;  %v581_v36 = vld [vmem:[%s580_s21] sm:$0x1] }
 0x1a9   :  { %985 = vmatmul.msk.f32.vlgmr.msrb.gmra.mxu1 %vm116_vm0, %v1051_v37  ;;  %995 = vmatmul.msk.f32.vlgmr.msrb.gmra.mxu2 %vm116_vm0, %v1051_v37 }
 0x1aa   :  { %835 = vmatpush.msrb.mxu2 %v1155_v0  ;;  %760 = vmatpush.msrb.mxu1 %v1212_v6  ;;  %v375_v0 = vld [vmem:[%s374_s25] sm:$0x1]  ;;  %s999_s25 = sld [smem:[#allocation2 + $0x201]] }
 0x1ac   :  { %836 = vmatpush.msrb.mxu2 %v1160_v1  ;;  %761 = vmatpush.msrb.mxu1 %v1218_v7  ;;  %v378_v1 = vld [vmem:[%s377_s29] sm:$0x1]  ;;  %s683_s30 = scalar_lea.vmem %s1595_s1, %s1024_s6  ;;  %s1033_s6 = sld [smem:[#allocation2 + $0x382]] }
 0x1ad   :  { %v398_v39 = vrot.slane %v378_v1, 6  ;;  %s1036_s29 = sld [smem:[#allocation2 + $0x385]] }
 0x1ae   :  { %837 = vmatpush.msrb.mxu2 %v1167_v2  ;;  %762 = vmatpush.msrb.mxu1 %v1227_v10  ;;  %v395_v2 = vrot.slane %v375_v0, 7 }
 0x1b0   :  { %838 = vmatpush.msrb.mxu2 %v1174_v3  ;;  %763 = vmatpush.msrb.mxu1 %v1236_v12  ;;  %v372_v3 = vld [vmem:[%s371_s3] sm:$0x1]  ;;  %s474_s9 = scalar_lea.vmem %s1595_s1, %s999_s25  ;;  %s1002_s3 = sld [smem:[#allocation2 + $0x204]] }
 0x1b1   :  { %v415_v40 = vsel %vm98_vm1, %v372_v3, %v395_v2  ;;  %v475_v63 = vld [vmem:[%s474_s9] sm:$0x1]  ;;  %s489_s25 = scalar_lea.vmem %s1595_s1, %s1004_s2  ;;  %s1010_s9 = sld [smem:[#allocation2 + $0x281]]  ;;  %v601_v2 = vrot.slane %v581_v36, 5 }
 0x1b2   :  { %v416_v43 = vsel %vm100_vm2, %v415_v40, %v398_v39  ;;  %v490_v16 = vld [vmem:[%s489_s25] sm:$0x1]  ;;  %s1016_s25 = sld [smem:[#allocation2 + $0x287]] }
 0x1b3   :  { %v417_v46 = vsel %vm102_vm3, %v416_v43, %v401_v42  ;;  %v510_v20 = vrot.slane %v490_v16, 2  ;;  %v607_v42 = vrot.slane %v587_v38, 3 }
 0x1b4   :  { %v418_v49 = vsel %vm104_vm4, %v417_v46, %v404_v45 }
 0x1b5   :  { %v419_v52 = vsel %vm106_vm5, %v418_v49, %v407_v48 }
 0x1b6   :  { %v420_v54 = vsel %vm108_vm6, %v419_v52, %v410_v51  ;;  %s483_s19 = scalar_lea.vmem %s1595_s1, %s1002_s3  ;;  %s1011_s3 = sld [smem:[#allocation2 + $0x282]] }
 0x1b7   :  { %v421_v57 = vsel %vm110_vm7, %v420_v54, %v413_v53  ;;  %v484_v8 = vld [vmem:[%s483_s19] sm:$0x1]  ;;  %s574_s13 = scalar_lea.vmem %s1595_s1, %s1010_s9  ;;  %s589_s9 = scalar_lea.vmem %s1595_s1, %s1015_s4 }
 0x1b8   :  { %v422_v59 = vadd.f32 %v1274_v30, %v421_v57  ;;  %v504_v14 = vrot.slane %v484_v8, 4  ;;  %v575_v32 = vld [vmem:[%s574_s13] sm:$0x1]  ;;  %s592_s11 = scalar_lea.vmem %s1595_s1, %s1016_s25  ;;  %s1021_s13 = sld [smem:[#allocation2 + $0x301]] }
 0x1b9   :  { %v595_v34 = vrot.slane %v575_v32, 7  ;;  %v590_v41 = vld [vmem:[%s589_s9] sm:$0x1]  ;;  %s1027_s9 = sld [smem:[#allocation2 + $0x307]]  ;;  %s777_s25 = scalar_lea.vmem %s1595_s1, %s1033_s6 }
 0x1ba   :  { %v593_v44 = vld [vmem:[%s592_s11] sm:$0x1]  ;;  %v610_v45 = vrot.slane %v590_v41, 2  ;;  %s686_s11 = scalar_lea.vmem %s1595_s1, %s1025_s24  ;;  %s1034_s19 = sld [smem:[#allocation2 + $0x383]] }
 0x1bb   :  { %v615_v0 = vsel %vm98_vm1, %v572_v35, %v595_v34  ;;  %v613_v47 = vrot.slane %v593_v44, 1 }
 0x1bc   :  { %s577_s5 = scalar_lea.vmem %s1595_s1, %s1011_s3 }
 0x1bd   :  { %v578_v33 = vld [vmem:[%s577_s5] sm:$0x1] }
 0x1be   :  { %v598_v37 = vrot.slane %v578_v33, 6  ;;  %s674_s2 = scalar_lea.vmem %s1595_s1, %s1021_s13  ;;  %s689_s13 = scalar_lea.vmem %s1595_s1, %s1026_s27 }
 0x1bf   :  { %v675_v57 = vld [vmem:[%s674_s2] sm:$0x1]  ;;  %s692_s16 = scalar_lea.vmem %s1595_s1, %s1027_s9  ;;  %s1032_s2 = sld [smem:[#allocation2 + $0x381]] }
 0x1c0   :  { %v616_v3 = vsel %vm100_vm2, %v615_v0, %v598_v37  ;;  %v690_v8 = vld [vmem:[%s689_s13] sm:$0x1]  ;;  %s780_s3 = scalar_lea.vmem %s1595_s1, %s1034_s19  ;;  %s1038_s13 = sld [smem:[#allocation2 + $0x387]] }
 0x1c1   :  { %v617_v40 = vsel %vm102_vm3, %v616_v3, %v601_v2  ;;  %v693_v13 = vld [vmem:[%s692_s16] sm:$0x1]  ;;  %s786_s16 = scalar_lea.vmem %s1595_s1, %s1036_s29 }
 0x1c2   :  { %v713_v16 = vrot.slane %v693_v13, 1  ;;  %v787_v36 = vld [vmem:[%s786_s16] sm:$0x1] }
 0x1c3   :  { %v807_v2 = vrot.slane %v787_v36, 3 }
 0x1c5   :  { %s774_s4 = scalar_lea.vmem %s1595_s1, %s1032_s2  ;;  %s789_s2 = scalar_lea.vmem %s1595_s1, %s1037_s10 }
 0x1c6   :  { %s792_s19 = scalar_lea.vmem %s1595_s1, %s1038_s13 }
 0x1c7   :  { %v793_v38 = vld [vmem:[%s792_s19] sm:$0x1] }
 0x1c8   :  { %v813_v41 = vrot.slane %v793_v38, 1 }
 0x226   :  { %v365_v55 = vpop.f32.mrf.mxu1 }
 0x227   :  { %v366_v58 = vadd.f32 %v1320_v56, %v365_v55 }
 0x229   :  { %986 = vst.msk [vmem:[%s1601_s7 + $0x10] sm:$0xff] %vm168_vm8, %v366_v58 }
 0x22c   :  { %v440_v60 = vpop.f32.mrf.mxu2 }
 0x22d   :  { %v443_v61 = vadd.f32 %v440_v60, %v422_v59  ;;  %v695_v59 = vrot.slane %v675_v57, 7  ;;  %v672_v60 = vld [vmem:[%s671_s22] sm:$0x1]  ;;  %s1035_s22 = sld [smem:[#allocation2 + $0x384]] }
 0x22f   :  { %1052 = vtanh.f32 %v443_v61  ;;  %v681_v61 = vld [vmem:[%s680_s26] sm:$0x1] }
 0x233   :  { %s783_s0 = scalar_lea.vmem %s1595_s1, %s1035_s22 }
 0x234   :  { %v784_v33 = vld [vmem:[%s783_s0] sm:$0x1] }
 0x235   :  { %v1053_v62 = vpop.eup %1052  ;;  %v804_v37 = vrot.slane %v784_v33, 4 }
 0x236   :  { %996 = vmatmul.msk.f32.vlgmr.msrb.gmra.mxu3 %vm116_vm0, %v1053_v62  ;;  %1006 = vmatmul.msk.f32.vlgmr.msra.gmra.mxu0 %vm116_vm0, %v1053_v62 }
 0x237   :  { %860 = vmatpush.msrb.mxu3 %v1212_v6  ;;  %v478_v6 = vld [vmem:[%s477_s12] sm:$0x1] }
 0x238   :  { %v498_v4 = vrot.slane %v478_v6, 6  ;;  %v684_v6 = vld [vmem:[%s683_s30] sm:$0x1] }
 0x239   :  { %861 = vmatpush.msrb.mxu3 %v1218_v7  ;;  %v495_v7 = vrot.slane %v475_v63, 7  ;;  %v715_v63 = vsel %vm98_vm1, %v672_v60, %v695_v59 }
 0x23b   :  { %862 = vmatpush.msrb.mxu3 %v1227_v10  ;;  %v472_v10 = vld [vmem:[%s471_s14] sm:$0x1]  ;;  %s1013_s14 = sld [smem:[#allocation2 + $0x284]] }
 0x23c   :  { %v515_v5 = vsel %vm98_vm1, %v472_v10, %v495_v7  ;;  %v701_v7 = vrot.slane %v681_v61, 5 }
 0x23d   :  { %863 = vmatpush.msrb.mxu3 %v1236_v12  ;;  %v481_v12 = vld [vmem:[%s480_s17] sm:$0x1]  ;;  %v516_v11 = vsel %vm100_vm2, %v515_v5, %v498_v4  ;;  %v704_v4 = vrot.slane %v684_v6, 4 }
 0x23e   :  { %v501_v9 = vrot.slane %v481_v12, 5  ;;  %v687_v12 = vld [vmem:[%s686_s11] sm:$0x1] }
 0x240   :  { %v517_v15 = vsel %vm102_vm3, %v516_v11, %v501_v9  ;;  %v707_v9 = vrot.slane %v687_v12, 3 }
 0x241   :  { %v518_v18 = vsel %vm104_vm4, %v517_v15, %v504_v14  ;;  %s583_s23 = scalar_lea.vmem %s1595_s1, %s1013_s14  ;;  %s1022_s14 = sld [smem:[#allocation2 + $0x302]]  ;;  %v710_v14 = vrot.slane %v690_v8, 2 }
 0x242   :  { %v519_v21 = vsel %vm106_vm5, %v518_v18, %v507_v17  ;;  %v584_v1 = vld [vmem:[%s583_s23] sm:$0x1]  ;;  %s880_s23 = sshll.u32 %s1602_s8, 4  ;;  %s881_s23 = int_to_ptr.hbm [resolvable:$true] %s880_s23 }
 0x243   :  { %v520_v23 = vsel %vm108_vm6, %v519_v21, %v510_v20  ;;  %v604_v39 = vrot.slane %v584_v1, 4  ;;  %v790_v1 = vld [vmem:[%s789_s2] sm:$0x1] }
 0x244   :  { %v521_v24 = vsel %vm110_vm7, %v520_v23, %v513_v22 }
 0x245   :  { %v522_v25 = vadd.f32 %v1274_v30, %v521_v24  ;;  %v618_v43 = vsel %vm104_vm4, %v617_v40, %v604_v39  ;;  %v810_v39 = vrot.slane %v790_v1, 2 }
 0x246   :  { %v619_v46 = vsel %vm106_vm5, %v618_v43, %v607_v42 }
 0x247   :  { %v620_v48 = vsel %vm108_vm6, %v619_v46, %v610_v45  ;;  %s677_s20 = scalar_lea.vmem %s1595_s1, %s1022_s14  ;;  %s1103_s1 = smov [#allocation5]  }
 0x248   :  { %v621_v50 = vsel %vm110_vm7, %v620_v48, %v613_v47  ;;  %v678_v58 = vld [vmem:[%s677_s20] sm:$0x1] }
 0x249   :  { %v622_v52 = vadd.f32 %v1274_v30, %v621_v50  ;;  %v698_v62 = vrot.slane %v678_v58, 6 }
 0x24b   :  { %v716_v10 = vsel %vm100_vm2, %v715_v63, %v698_v62 }
 0x24c   :  { %v717_v5 = vsel %vm102_vm3, %v716_v10, %v701_v7 }
 0x24d   :  { %v718_v11 = vsel %vm104_vm4, %v717_v5, %v704_v4 }
 0x24e   :  { %v719_v15 = vsel %vm106_vm5, %v718_v11, %v707_v9 }
 0x24f   :  { %v720_v17 = vsel %vm108_vm6, %v719_v15, %v710_v14 }
 0x250   :  { %v721_v18 = vsel %vm110_vm7, %v720_v17, %v713_v16 }
 0x251   :  { %v722_v19 = vadd.f32 %v1274_v30, %v721_v18 }
 0x2b3   :  { %v540_v26 = vpop.f32.mrf.mxu0 }
 0x2b4   :  { %v543_v27 = vadd.f32 %v540_v26, %v522_v25  ;;  %v775_v25 = vld [vmem:[%s774_s4] sm:$0x1]  ;;  %s878_s4 = sshll.u32 %s1103_s1, 4  ;;  %s879_s4 = int_to_ptr.vmem [resolvable:$true] %s878_s4 }
 0x2b5   :  { %v778_v26 = vld [vmem:[%s777_s25] sm:$0x1] }
 0x2b6   :  { %1054 = vtanh.f32 %v543_v27  ;;  %v795_v27 = vrot.slane %v775_v25, 7 }
 0x2b9   :  { %v465_v28 = vpop.f32.mrf.mxu3 }
 0x2ba   :  { %v466_v29 = vadd.f32 %v1320_v56, %v465_v28  ;;  %v772_v28 = vld [vmem:[%s771_s28] sm:$0x1] }
 0x2bb   :  { %v815_v32 = vsel %vm98_vm1, %v772_v28, %v795_v27 }
 0x2bc   :  { %v1055_v31 = vpop.eup %1054  ;;  %997 = vst.msk [vmem:[%s1601_s7 + $0x18] sm:$0xff] %vm168_vm8, %v466_v29  ;;  %v781_v29 = vld [vmem:[%s780_s3] sm:$0x1] }
 0x2bd   :  { %1007 = vmatmul.msk.f32.vlgmr.msra.gmra.mxu1 %vm116_vm0, %v1055_v31  ;;  %1017 = vmatmul.msk.f32.vlgmr.msra.gmra.mxu2 %vm116_vm0, %v1055_v31  ;;  %v798_v31 = vrot.slane %v778_v26, 6  ;;  %v801_v34 = vrot.slane %v781_v29, 5 }
 0x2bf   :  { %v816_v35 = vsel %vm100_vm2, %v815_v32, %v798_v31 }
 0x2c0   :  { %v817_v0 = vsel %vm102_vm3, %v816_v35, %v801_v34 }
 0x2c1   :  { %v818_v3 = vsel %vm104_vm4, %v817_v0, %v804_v37 }
 0x2c2   :  { %v819_v40 = vsel %vm106_vm5, %v818_v3, %v807_v2 }
 0x2c3   :  { %v820_v42 = vsel %vm108_vm6, %v819_v40, %v810_v39 }
 0x2c4   :  { %v821_v44 = vsel %vm110_vm7, %v820_v42, %v813_v41 }
 0x2c5   :  { %v822_v46 = vadd.f32 %v1274_v30, %v821_v44 }
 0x33a   :  { %v565_v49 = vpop.f32.mrf.mxu1 }
 0x33b   :  { %v566_v51 = vadd.f32 %v1320_v56, %v565_v49 }
 0x33d   :  { %1008 = vst.msk [vmem:[%s1601_s7 + $0x20] sm:$0xff] %vm168_vm8, %v566_v51 }
 0x340   :  { %v640_v53 = vpop.f32.mrf.mxu2 }
 0x341   :  { %v643_v54 = vadd.f32 %v640_v53, %v622_v52 }
 0x343   :  { %1056 = vtanh.f32 %v643_v54 }
 0x349   :  { %v1057_v55 = vpop.eup %1056 }
 0x34a   :  { %1018 = vmatmul.msk.f32.vlgmr.msra.gmra.mxu3 %vm116_vm0, %v1057_v55  ;;  %1028 = vmatmul.msk.f32.vlgmr.msrb.gmra.mxu0 %vm116_vm0, %v1057_v55 }
 0x3c7   :  { %v740_v20 = vpop.f32.mrf.mxu0 }
 0x3c8   :  { %v743_v21 = vadd.f32 %v740_v20, %v722_v19 }
 0x3ca   :  { %1058 = vtanh.f32 %v743_v21 }
 0x3cd   :  { %v665_v22 = vpop.f32.mrf.mxu3 }
 0x3ce   :  { %v666_v23 = vadd.f32 %v1320_v56, %v665_v22 }
 0x3d0   :  { %v1059_v24 = vpop.eup %1058  ;;  %1019 = vst.msk [vmem:[%s1601_s7 + $0x28] sm:$0xff] %vm168_vm8, %v666_v23 }
 0x3d1   :  { %1029 = vmatmul.msk.f32.vlgmr.msrb.gmra.mxu1 %vm116_vm0, %v1059_v24  ;;  %1039 = vmatmul.msk.f32.vlgmr.msrb.gmra.mxu2 %vm116_vm0, %v1059_v24 }
 0x44e   :  { %v765_v43 = vpop.f32.mrf.mxu1 }
 0x44f   :  { %v766_v45 = vadd.f32 %v1320_v56, %v765_v43 }
 0x451   :  { %1030 = vst.msk [vmem:[%s1601_s7 + $0x30] sm:$0xff] %vm168_vm8, %v766_v45 }
 0x454   :  { %v840_v47 = vpop.f32.mrf.mxu2 }
 0x455   :  { %v843_v48 = vadd.f32 %v840_v47, %v822_v46 }
 0x457   :  { %1060 = vtanh.f32 %v843_v48 }
 0x45d   :  { %v1061_v49 = vpop.eup %1060 }
 0x45e   :  { %870 = vst.msk [vmem:[#allocation5] sm:$0xff] %vm116_vm0, %v1061_v49  ;;  %1040 = vmatmul.msk.f32.vlgmr.msrb.gmra.mxu3 %vm116_vm0, %v1061_v49 }
 0x45f   :  { %883 = dma.vmem_to_hbm [thread:$0]  %s879_s4, 128, %s881_s23, [#allocation3]  }
 0x4e1   :  { %v865_v50 = vpop.f32.mrf.mxu3 }
 0x4e2   :  { %v866_v30 = vadd.f32 %v1320_v56, %v865_v50 }
 0x4e4   :  { %1041 = vst.msk [vmem:[%s1601_s7 + $0x38] sm:$0xff] %vm168_vm8, %v866_v30 }
 0x4e5   :  { %1100 = dma.done.wait [#allocation3], 128  }
 0x4e6   :  { %1101 = vsyncadd [#allocation3], 4294967168 }
 0x4e7   :  { %890 = vsyncpa [#allocation3], 1 }
 0x4e8   :  { %891 = vsyncpa [#allocation4], 1 }

</bundles_post_ra>
